<compile_context>
chip_gen: v6e
topology: v6e:2x2x1
jax: 0.10.0
libtpu: 0.0.40
codegen_flags: <defaults>
</compile_context>

<pallas_src>
import functools

import jax
import jax.numpy as jnp
from jax import lax
from jax.experimental import pallas as pl
from jax.experimental.pallas import tpu as pltpu


# ----------------------------------------------------------------------------
# In-kernel helpers
# ----------------------------------------------------------------------------
def _vpu_dot(cols, rows):
    """(M, K) @ (K, Nc) as K unrolled broadcast mul-adds on the VPU.

    Every head contraction here has K in [3..8]; pushing that through the
    MXU is almost pure fill/drain latency.  The caller passes pre-sliced
    (and, for loop-invariant weights, pre-broadcast) column/row operands so
    nothing invariant is re-emitted per rollout step.
    """
    acc = cols[0] * rows[0]
    for ck, rk in zip(cols[1:], rows[1:]):
        acc = acc + ck * rk
    return acc


def _argmax_onehot_rows(x):
    """One-hot of argmax along axis 0 (first occurrence on ties).

    axis-0 max/min lower to XLU sublane reductions -- the XLU slot is
    otherwise idle in this kernel, keeping the saturating VALU slot free.
    """
    M = x.shape[0]
    m = jnp.max(x, axis=0, keepdims=True)                                  # (1, Nc)
    idx = lax.broadcasted_iota(jnp.int32, x.shape, 0).astype(jnp.float32)
    first = jnp.min(jnp.where(x >= m, idx, float(M)), axis=0, keepdims=True)
    return (idx == first).astype(jnp.float32)


# ----------------------------------------------------------------------------
# Kernel
# ----------------------------------------------------------------------------
def imagination_core_kernel(dims, offs, palette,
                            big_ref,          # (8-aligned rows, N): [s0 ; bcastT]
                            small_ref,        # (8-aligned rows, ncols): tiny weights
                            states_out_ref,   # (T, C, N)   lane-dense
                            rewards_out_ref,  # (T, NR, RB) tiny one-hot rewards
                            ):
    C, NP, A, NR = dims["C"], dims["NP"], dims["A"], dims["NR"]
    RB, N, HW, T = dims["RB"], dims["N"], dims["HW"], dims["T"]

    # ---- carve the two coalesced input slabs (static ref slices) ----
    s = big_ref[offs["s0"]:offs["s0"] + C, :]                    # (C, N)  imagined state
    bcastT = big_ref[offs["bc"]:offs["bc"] + RB, :]              # (RB, N) 0/1 block-diag

    def cut(name, nrows, ncols):
        r0 = offs[name]
        return small_ref[r0:r0 + nrows, 0:ncols]

    w_ssT = cut("w_ss", NP, C)          # env-model state head / state channels
    w_saT = cut("w_sa", NP, A)          # env-model state head / action channels
    b_s   = cut("b_s",  NP, 1)
    w_raT = cut("w_ra", NR, A)          # env-model reward head / action channels
    w_rpT = cut("w_rp", NR + A, C)      # stacked [reward(state part) ; distil policy]
    b_rp  = cut("b_rp", NR + A, 1)
    a     = cut("a0",   A, RB)          # (A, RB) initial one-hot action

    # ---- hoist loop-invariant slices / broadcasts out of the unrolled T loop ----
    w_ss_cols = [jnp.broadcast_to(w_ssT[:, k:k + 1], (NP, N)) for k in range(C)]
    w_sa_cols = [w_saT[:, k:k + 1] for k in range(A)]
    w_ra_cols = [w_raT[:, k:k + 1] for k in range(A)]
    w_rp_cols = [w_rpT[:, k:k + 1] for k in range(C)]
    bcast_rows = [bcastT[k:k + 1, :] for k in range(RB)]
    s_rows = [s[k:k + 1, :] for k in range(C)]
    inv_hw = 1.0 / float(HW)
    # binary palette: which one-hot pixel-class rows light up each RGB channel
    chan_sel = [[p for p in range(NP) if palette[p][c] == 1.0] for c in range(C)]
    zero_row = (jnp.zeros((1, N), jnp.float32)
                if any(len(sel) == 0 for sel in chan_sel) else None)

    # Fully unrolled serial rollout (T small & static).
    # TODO(synk): if T grows, switch to lax.fori_loop(..., unroll=True) with a
    #             carry to bound live ranges / code size.
    for t in range(T):
        # Per-rollout-batch mean pool: the only K=N(=512) contraction -> MXU.
        # Contract over the N axis of BOTH operands so no lane-padded (N, RB)
        # pool matrix is ever materialized.
        pooled = lax.dot_general(s, bcastT, (((1,), (1,)), ((), ())),
                                 preferred_element_type=jnp.float32) * inv_hw
        pooled_rows = [pooled[k:k + 1, :] for k in range(C)]      # rows of (C, RB)

        # Fused [reward-head state part ; distil-policy] on the pooled state.
        rp = _vpu_dot(w_rp_cols, pooled_rows) + b_rp              # (NR+A, RB)

        if t > 0:
            # distil_policy.act(previous imagined state)
            # TODO(synk): reference samples from a Categorical; argmax here.
            a = _argmax_onehot_rows(rp[NR:NR + A, :])             # (A, RB)
        a_rows = [a[k:k + 1, :] for k in range(A)]

        # --- env-model state head: 1x1 conv over cat([state, onehot act]) ---
        # The action is constant across the HW pixels of a batch element, so
        # its contribution (+ bias) is computed per-RB and spread to pixels
        # through the 0/1 block-diagonal broadcast matrix.
        a_term = _vpu_dot(w_sa_cols, a_rows) + b_s                # (NP, RB)
        logits_s = (_vpu_dot(w_ss_cols, s_rows)
                    + _vpu_dot([a_term[:, k:k + 1] for k in range(RB)],
                               bcast_rows))                       # (NP, N)

        # softmax(dim=1).max(1)[1] == argmax of logits (softmax is monotone);
        # target_to_pix: binary palette -> each RGB channel is a max over its
        # selected one-hot pixel-class rows (no multiplies).
        pix_oh = _argmax_onehot_rows(logits_s)                    # (NP, N)
        chan_rows = []
        for c in range(C):
            sel = chan_sel[c]
            if not sel:
                chan_rows.append(zero_row)
                continue
            r = pix_oh[sel[0]:sel[0] + 1, :]
            for p in sel[1:]:
                r = jnp.maximum(r, pix_oh[p:p + 1, :])
            chan_rows.append(r)
        next_s = jnp.concatenate(chan_rows, axis=0)               # (C, N)

        # --- env-model reward head: add action term, one-hot argmax ---
        logits_r = rp[0:NR, :] + _vpu_dot(w_ra_cols, a_rows)      # (NR, RB)
        rew_oh = _argmax_onehot_rows(logits_r)

        states_out_ref[t] = next_s        # lane-dense (C, N) store
        rewards_out_ref[t] = rew_oh       # tiny (NR, RB) store

        s = next_s
        s_rows = chan_rows


# ----------------------------------------------------------------------------
# Wrapper
# ----------------------------------------------------------------------------
def _pack_rows(parts, ncols, align=8):
    """Pack small 2-D arrays into one (rows, ncols) slab; each part starts at
    a sublane-aligned row offset.  Returns (slab, {name: row_offset})."""
    offs, blocks, r = {}, [], 0
    for name, m in parts:
        nr = -(-m.shape[0] // align) * align
        offs[name] = r
        blocks.append(jnp.pad(m, ((0, nr - m.shape[0]), (0, ncols - m.shape[1]))))
        r += nr
    return jnp.concatenate(blocks, axis=0), offs


def imagination_core_forward(state_nchw, params, *, num_rollouts, num_actions,
                             num_rewards, pixels):
    """Full-rollout ImaginationCore forward.

    state_nchw: (B, C, H, W) float32
    returns: rollout_states  (num_rollouts, B*num_actions, C, H, W)
             rollout_rewards (num_rollouts, B*num_actions, num_rewards)
    """
    B, C, H, W = state_nchw.shape
    A, NR, T = num_actions, num_rewards, num_rollouts
    NP = len(pixels)
    HW = H * W
    RB = B * A          # rollout batch size (full_rollout=True)
    N = RB * HW         # lane-dense pixel axis

    assert all(len(p) == C for p in pixels)
    assert all(v in (0.0, 1.0) for p in pixels for v in p), "binary palette expected"

    # full_rollout replication, matching torch semantics exactly:
    #   state_rep[j] = state[j % B];  action[j] = j % A
    state_rep = jnp.tile(state_nchw, (A, 1, 1, 1))                 # (RB, C, H, W)
    action = jnp.tile(jnp.arange(A, dtype=jnp.int32), B)           # (RB,)

    # NCHW -> channel-major, pixel-flattened; pixel index j = rb*HW + h*W + w
    s0 = jnp.transpose(state_rep, (1, 0, 2, 3)).reshape(C, N)      # (C, N)
    a0 = jax.nn.one_hot(action, A, dtype=jnp.float32).T            # (A, RB)

    # 0/1 block-diagonal broadcast matrix (RB, N): row rb is 1 on its HW lanes.
    rb_of = jnp.arange(N, dtype=jnp.int32) // HW
    bcastT = (jnp.arange(RB, dtype=jnp.int32)[:, None] == rb_of[None, :]
              ).astype(jnp.float32)

    (w_ss, w_sa, b_s, w_rs, w_ra, b_r, w_p, b_p) = params

    # Coalesce inputs into two slabs (2 DMAs instead of 13):
    #   big   : lane-dense (rows, N)    = [s0 ; bcastT]
    #   small : (rows, max-cols)        = all tiny weights/biases + a0, with the
    #           reward(state-part) and policy heads pre-stacked.
    big, offs_big = _pack_rows([("s0", s0), ("bc", bcastT)], N)
    small_parts = [
        ("w_ss", w_ss.T),                                          # (NP, C)
        ("w_sa", w_sa.T),                                          # (NP, A)
        ("b_s",  b_s.reshape(NP, 1)),                              # (NP, 1)
        ("w_ra", w_ra.T),                                          # (NR, A)
        ("w_rp", jnp.concatenate([w_rs.T, w_p.T], axis=0)),        # (NR+A, C)
        ("b_rp", jnp.concatenate([b_r.reshape(NR, 1),
                                  b_p.reshape(A, 1)], axis=0)),    # (NR+A, 1)
        ("a0",   a0),                                              # (A, RB)
    ]
    small, offs_small = _pack_rows(small_parts, max(RB, A, C, 1))
    offs = {**offs_big, **offs_small}

    dims = dict(C=C, NP=NP, A=A, NR=NR, RB=RB, N=N, HW=HW, T=T)
    palette = tuple(tuple(float(v) for v in p) for p in pixels)

    # TODO(synk): the rollout is inherently serial; on v7x a second TensorCore
    #             would only help with an independent leading batch axis.
    vmem = lambda: pl.BlockSpec(memory_space=pltpu.MemorySpace.VMEM)

    states_cm, rewards_cm = pl.pallas_call(
        functools.partial(imagination_core_kernel, dims, offs, palette),
        out_shape=(
            jax.ShapeDtypeStruct((T, C, N), jnp.float32),     # lane-dense states
            jax.ShapeDtypeStruct((T, NR, RB), jnp.float32),   # tiny one-hot rewards
        ),
        in_specs=[vmem(), vmem()],
        out_specs=(vmem(), vmem()),
    )(big, small)

    # channel-major -> PyTorch rollout order (glue)
    rollout_states = jnp.transpose(
        states_cm.reshape(T, C, RB, H, W), (0, 2, 1, 3, 4))        # (T, RB, C, H, W)
    rollout_rewards = jnp.transpose(rewards_cm, (0, 2, 1))         # (T, RB, NR)
    return rollout_states, rollout_rewards


# ----------------------------------------------------------------------------
# Main
# ----------------------------------------------------------------------------
if __name__ == "__main__":
    # Small shapes consistent with the module: minipacman-like RGB frames.
    B, C, H, W = 2, 3, 8, 8          # in_shape = (3, 8, 8)
    A = 4                            # num_actions
    NR = 10                          # num_rewards (mode='regular')
    T = 3                            # num_rollouts
    # fixed pixel palette from the reference code (7 categories -> RGB)
    pixels = ((0.0, 1.0, 0.0), (0.0, 1.0, 1.0), (0.0, 0.0, 1.0),
              (1.0, 1.0, 1.0), (1.0, 1.0, 0.0), (0.0, 0.0, 0.0),
              (1.0, 0.0, 0.0))
    NP = len(pixels)

    key = jax.random.PRNGKey(0)
    k_state, k1, k2, k3, k4, k5, k6, k7, k8 = jax.random.split(key, 9)

    # example input state (NCHW), and deterministic synthetic parameters for
    # the external env_model (1x1-conv state head + pooled linear reward head)
    # and the pooled linear distil_policy.
    state = jax.random.uniform(k_state, (B, C, H, W), dtype=jnp.float32)

    params = (
        jax.random.normal(k1, (C, NP), dtype=jnp.float32) * 0.5,   # w_ss
        jax.random.normal(k2, (A, NP), dtype=jnp.float32) * 0.5,   # w_sa
        jax.random.normal(k3, (1, NP), dtype=jnp.float32) * 0.1,   # b_s
        jax.random.normal(k4, (C, NR), dtype=jnp.float32) * 0.5,   # w_rs
        jax.random.normal(k5, (A, NR), dtype=jnp.float32) * 0.5,   # w_ra
        jax.random.normal(k6, (1, NR), dtype=jnp.float32) * 0.1,   # b_r
        jax.random.normal(k7, (C, A), dtype=jnp.float32) * 0.5,    # w_p
        jax.random.normal(k8, (1, A), dtype=jnp.float32) * 0.1,    # b_p
    )

    fwd = jax.jit(functools.partial(
        imagination_core_forward,
        num_rollouts=T, num_actions=A, num_rewards=NR, pixels=pixels))

    rollout_states, rollout_rewards = fwd(state, params)
    jax.block_until_ready((rollout_states, rollout_rewards))

    assert rollout_states.shape == (T, B * A, C, H, W)
    assert rollout_rewards.shape == (T, B * A, NR)
    # imagined states must be valid (binary) palette pixels; rewards one-hot
    assert bool(jnp.all((rollout_states == 0.0) | (rollout_states == 1.0)))
    assert bool(jnp.all(jnp.sum(rollout_rewards, axis=-1) == 1.0))

    print("KERNEL_OK")
</pallas_src>

<mosaic_0001>
module attributes {stable_mosaic.version = 11 : i64} {
  func.func @imagination_core_kernel(%arg0: memref<16x512xf32, #tpu.memory_space<vmem>>, %arg1: memref<80x8xf32, #tpu.memory_space<vmem>>, %arg2: memref<3x3x512xf32, #tpu.memory_space<vmem>>, %arg3: memref<3x10x8xf32, #tpu.memory_space<vmem>>) attributes {dimension_semantics = [], scalar_prefetch = 0 : i64, scratch_operands = 0 : i64, tpu.core_type = #tpu.core_type<tc>} {
    %c0 = arith.constant 0 : index
    %c0_0 = arith.constant 0 : index
    %0 = vector.load %arg0[%c0, %c0_0] : memref<16x512xf32, #tpu.memory_space<vmem>>, vector<3x512xf32>
    %c8 = arith.constant 8 : index
    %c0_1 = arith.constant 0 : index
    %1 = vector.load %arg0[%c8, %c0_1] : memref<16x512xf32, #tpu.memory_space<vmem>>, vector<8x512xf32>
    %c0_2 = arith.constant 0 : index
    %c0_3 = arith.constant 0 : index
    %2 = vector.load %arg1[%c0_2, %c0_3] : memref<80x8xf32, #tpu.memory_space<vmem>>, vector<7x3xf32>
    %c8_4 = arith.constant 8 : index
    %c0_5 = arith.constant 0 : index
    %3 = vector.load %arg1[%c8_4, %c0_5] : memref<80x8xf32, #tpu.memory_space<vmem>>, vector<7x4xf32>
    %c16 = arith.constant 16 : index
    %c0_6 = arith.constant 0 : index
    %4 = vector.load %arg1[%c16, %c0_6] : memref<80x8xf32, #tpu.memory_space<vmem>>, vector<7x1xf32>
    %c24 = arith.constant 24 : index
    %c0_7 = arith.constant 0 : index
    %5 = vector.load %arg1[%c24, %c0_7] : memref<80x8xf32, #tpu.memory_space<vmem>>, vector<10x4xf32>
    %c40 = arith.constant 40 : index
    %c0_8 = arith.constant 0 : index
    %6 = vector.load %arg1[%c40, %c0_8] : memref<80x8xf32, #tpu.memory_space<vmem>>, vector<14x3xf32>
    %c56 = arith.constant 56 : index
    %c0_9 = arith.constant 0 : index
    %7 = vector.load %arg1[%c56, %c0_9] : memref<80x8xf32, #tpu.memory_space<vmem>>, vector<14x1xf32>
    %c72 = arith.constant 72 : index
    %c0_10 = arith.constant 0 : index
    %8 = vector.load %arg1[%c72, %c0_10] : memref<80x8xf32, #tpu.memory_space<vmem>>, vector<4x8xf32>
    %9 = vector.extract_strided_slice %2 {offsets = [0, 0], sizes = [7, 1], strides = [1, 1]} : vector<7x3xf32> to vector<7x1xf32>
    %10 = vector.shape_cast %9 : vector<7x1xf32> to vector<7x1xf32>
    %11 = vector.broadcast %10 : vector<7x1xf32> to vector<7x512xf32>
    %12 = vector.extract_strided_slice %2 {offsets = [0, 1], sizes = [7, 1], strides = [1, 1]} : vector<7x3xf32> to vector<7x1xf32>
    %13 = vector.shape_cast %12 : vector<7x1xf32> to vector<7x1xf32>
    %14 = vector.broadcast %13 : vector<7x1xf32> to vector<7x512xf32>
    %15 = vector.extract_strided_slice %2 {offsets = [0, 2], sizes = [7, 1], strides = [1, 1]} : vector<7x3xf32> to vector<7x1xf32>
    %16 = vector.shape_cast %15 : vector<7x1xf32> to vector<7x1xf32>
    %17 = vector.broadcast %16 : vector<7x1xf32> to vector<7x512xf32>
    %18 = vector.extract_strided_slice %3 {offsets = [0, 0], sizes = [7, 1], strides = [1, 1]} : vector<7x4xf32> to vector<7x1xf32>
    %19 = vector.extract_strided_slice %3 {offsets = [0, 1], sizes = [7, 1], strides = [1, 1]} : vector<7x4xf32> to vector<7x1xf32>
    %20 = vector.extract_strided_slice %3 {offsets = [0, 2], sizes = [7, 1], strides = [1, 1]} : vector<7x4xf32> to vector<7x1xf32>
    %21 = vector.extract_strided_slice %3 {offsets = [0, 3], sizes = [7, 1], strides = [1, 1]} : vector<7x4xf32> to vector<7x1xf32>
    %22 = vector.extract_strided_slice %5 {offsets = [0, 0], sizes = [10, 1], strides = [1, 1]} : vector<10x4xf32> to vector<10x1xf32>
    %23 = vector.extract_strided_slice %5 {offsets = [0, 1], sizes = [10, 1], strides = [1, 1]} : vector<10x4xf32> to vector<10x1xf32>
    %24 = vector.extract_strided_slice %5 {offsets = [0, 2], sizes = [10, 1], strides = [1, 1]} : vector<10x4xf32> to vector<10x1xf32>
    %25 = vector.extract_strided_slice %5 {offsets = [0, 3], sizes = [10, 1], strides = [1, 1]} : vector<10x4xf32> to vector<10x1xf32>
    %26 = vector.extract_strided_slice %6 {offsets = [0, 0], sizes = [14, 1], strides = [1, 1]} : vector<14x3xf32> to vector<14x1xf32>
    %27 = vector.extract_strided_slice %6 {offsets = [0, 1], sizes = [14, 1], strides = [1, 1]} : vector<14x3xf32> to vector<14x1xf32>
    %28 = vector.extract_strided_slice %6 {offsets = [0, 2], sizes = [14, 1], strides = [1, 1]} : vector<14x3xf32> to vector<14x1xf32>
    %29 = vector.extract_strided_slice %1 {offsets = [0, 0], sizes = [1, 512], strides = [1, 1]} : vector<8x512xf32> to vector<1x512xf32>
    %30 = vector.extract_strided_slice %1 {offsets = [1, 0], sizes = [1, 512], strides = [1, 1]} : vector<8x512xf32> to vector<1x512xf32>
    %31 = vector.extract_strided_slice %1 {offsets = [2, 0], sizes = [1, 512], strides = [1, 1]} : vector<8x512xf32> to vector<1x512xf32>
    %32 = vector.extract_strided_slice %1 {offsets = [3, 0], sizes = [1, 512], strides = [1, 1]} : vector<8x512xf32> to vector<1x512xf32>
    %33 = vector.extract_strided_slice %1 {offsets = [4, 0], sizes = [1, 512], strides = [1, 1]} : vector<8x512xf32> to vector<1x512xf32>
    %34 = vector.extract_strided_slice %1 {offsets = [5, 0], sizes = [1, 512], strides = [1, 1]} : vector<8x512xf32> to vector<1x512xf32>
    %35 = vector.extract_strided_slice %1 {offsets = [6, 0], sizes = [1, 512], strides = [1, 1]} : vector<8x512xf32> to vector<1x512xf32>
    %36 = vector.extract_strided_slice %1 {offsets = [7, 0], sizes = [1, 512], strides = [1, 1]} : vector<8x512xf32> to vector<1x512xf32>
    %37 = vector.extract_strided_slice %0 {offsets = [0, 0], sizes = [1, 512], strides = [1, 1]} : vector<3x512xf32> to vector<1x512xf32>
    %38 = vector.extract_strided_slice %0 {offsets = [1, 0], sizes = [1, 512], strides = [1, 1]} : vector<3x512xf32> to vector<1x512xf32>
    %39 = vector.extract_strided_slice %0 {offsets = [2, 0], sizes = [1, 512], strides = [1, 1]} : vector<3x512xf32> to vector<1x512xf32>
    %cst = arith.constant dense<0.000000e+00> : vector<3x8xf32>
    %40 = tpu.matmul %0, %1, %cst {dimension_numbers = #tpu.dot_dimension_numbers<[1], [1], [0], [0], [0, 0, 1, 0], [], []>} : vector<3x512xf32>, vector<8x512xf32>, vector<3x8xf32> -> vector<3x8xf32>
    %cst_11 = arith.constant 1.562500e-02 : f32
    %41 = vector.broadcast %cst_11 : f32 to vector<3x8xf32>
    %42 = arith.mulf %40, %41 : vector<3x8xf32>
    %43 = vector.extract_strided_slice %42 {offsets = [0, 0], sizes = [1, 8], strides = [1, 1]} : vector<3x8xf32> to vector<1x8xf32>
    %44 = vector.extract_strided_slice %42 {offsets = [1, 0], sizes = [1, 8], strides = [1, 1]} : vector<3x8xf32> to vector<1x8xf32>
    %45 = vector.extract_strided_slice %42 {offsets = [2, 0], sizes = [1, 8], strides = [1, 1]} : vector<3x8xf32> to vector<1x8xf32>
    %46 = vector.broadcast %26 : vector<14x1xf32> to vector<14x8xf32>
    %47 = vector.broadcast %43 : vector<1x8xf32> to vector<14x8xf32>
    %48 = arith.mulf %46, %47 : vector<14x8xf32>
    %49 = vector.broadcast %27 : vector<14x1xf32> to vector<14x8xf32>
    %50 = vector.broadcast %44 : vector<1x8xf32> to vector<14x8xf32>
    %51 = arith.mulf %49, %50 : vector<14x8xf32>
    %52 = arith.addf %48, %51 : vector<14x8xf32>
    %53 = vector.broadcast %28 : vector<14x1xf32> to vector<14x8xf32>
    %54 = vector.broadcast %45 : vector<1x8xf32> to vector<14x8xf32>
    %55 = arith.mulf %53, %54 : vector<14x8xf32>
    %56 = arith.addf %52, %55 : vector<14x8xf32>
    %57 = vector.broadcast %7 : vector<14x1xf32> to vector<14x8xf32>
    %58 = arith.addf %56, %57 : vector<14x8xf32>
    %59 = vector.extract_strided_slice %8 {offsets = [0, 0], sizes = [1, 8], strides = [1, 1]} : vector<4x8xf32> to vector<1x8xf32>
    %60 = vector.extract_strided_slice %8 {offsets = [1, 0], sizes = [1, 8], strides = [1, 1]} : vector<4x8xf32> to vector<1x8xf32>
    %61 = vector.extract_strided_slice %8 {offsets = [2, 0], sizes = [1, 8], strides = [1, 1]} : vector<4x8xf32> to vector<1x8xf32>
    %62 = vector.extract_strided_slice %8 {offsets = [3, 0], sizes = [1, 8], strides = [1, 1]} : vector<4x8xf32> to vector<1x8xf32>
    %63 = vector.broadcast %18 : vector<7x1xf32> to vector<7x8xf32>
    %64 = vector.broadcast %59 : vector<1x8xf32> to vector<7x8xf32>
    %65 = arith.mulf %63, %64 : vector<7x8xf32>
    %66 = vector.broadcast %19 : vector<7x1xf32> to vector<7x8xf32>
    %67 = vector.broadcast %60 : vector<1x8xf32> to vector<7x8xf32>
    %68 = arith.mulf %66, %67 : vector<7x8xf32>
    %69 = arith.addf %65, %68 : vector<7x8xf32>
    %70 = vector.broadcast %20 : vector<7x1xf32> to vector<7x8xf32>
    %71 = vector.broadcast %61 : vector<1x8xf32> to vector<7x8xf32>
    %72 = arith.mulf %70, %71 : vector<7x8xf32>
    %73 = arith.addf %69, %72 : vector<7x8xf32>
    %74 = vector.broadcast %21 : vector<7x1xf32> to vector<7x8xf32>
    %75 = vector.broadcast %62 : vector<1x8xf32> to vector<7x8xf32>
    %76 = arith.mulf %74, %75 : vector<7x8xf32>
    %77 = arith.addf %73, %76 : vector<7x8xf32>
    %78 = vector.broadcast %4 : vector<7x1xf32> to vector<7x8xf32>
    %79 = arith.addf %77, %78 : vector<7x8xf32>
    %80 = vector.broadcast %37 : vector<1x512xf32> to vector<7x512xf32>
    %81 = arith.mulf %11, %80 : vector<7x512xf32>
    %82 = vector.broadcast %38 : vector<1x512xf32> to vector<7x512xf32>
    %83 = arith.mulf %14, %82 : vector<7x512xf32>
    %84 = arith.addf %81, %83 : vector<7x512xf32>
    %85 = vector.broadcast %39 : vector<1x512xf32> to vector<7x512xf32>
    %86 = arith.mulf %17, %85 : vector<7x512xf32>
    %87 = arith.addf %84, %86 : vector<7x512xf32>
    %88 = vector.extract_strided_slice %79 {offsets = [0, 0], sizes = [7, 1], strides = [1, 1]} : vector<7x8xf32> to vector<7x1xf32>
    %89 = vector.extract_strided_slice %79 {offsets = [0, 1], sizes = [7, 1], strides = [1, 1]} : vector<7x8xf32> to vector<7x1xf32>
    %90 = vector.extract_strided_slice %79 {offsets = [0, 2], sizes = [7, 1], strides = [1, 1]} : vector<7x8xf32> to vector<7x1xf32>
    %91 = vector.extract_strided_slice %79 {offsets = [0, 3], sizes = [7, 1], strides = [1, 1]} : vector<7x8xf32> to vector<7x1xf32>
    %92 = vector.extract_strided_slice %79 {offsets = [0, 4], sizes = [7, 1], strides = [1, 1]} : vector<7x8xf32> to vector<7x1xf32>
    %93 = vector.extract_strided_slice %79 {offsets = [0, 5], sizes = [7, 1], strides = [1, 1]} : vector<7x8xf32> to vector<7x1xf32>
    %94 = vector.extract_strided_slice %79 {offsets = [0, 6], sizes = [7, 1], strides = [1, 1]} : vector<7x8xf32> to vector<7x1xf32>
    %95 = vector.extract_strided_slice %79 {offsets = [0, 7], sizes = [7, 1], strides = [1, 1]} : vector<7x8xf32> to vector<7x1xf32>
    %96 = vector.broadcast %88 : vector<7x1xf32> to vector<7x512xf32>
    %97 = vector.broadcast %29 : vector<1x512xf32> to vector<7x512xf32>
    %98 = arith.mulf %96, %97 : vector<7x512xf32>
    %99 = vector.broadcast %89 : vector<7x1xf32> to vector<7x512xf32>
    %100 = vector.broadcast %30 : vector<1x512xf32> to vector<7x512xf32>
    %101 = arith.mulf %99, %100 : vector<7x512xf32>
    %102 = arith.addf %98, %101 : vector<7x512xf32>
    %103 = vector.broadcast %90 : vector<7x1xf32> to vector<7x512xf32>
    %104 = vector.broadcast %31 : vector<1x512xf32> to vector<7x512xf32>
    %105 = arith.mulf %103, %104 : vector<7x512xf32>
    %106 = arith.addf %102, %105 : vector<7x512xf32>
    %107 = vector.broadcast %91 : vector<7x1xf32> to vector<7x512xf32>
    %108 = vector.broadcast %32 : vector<1x512xf32> to vector<7x512xf32>
    %109 = arith.mulf %107, %108 : vector<7x512xf32>
    %110 = arith.addf %106, %109 : vector<7x512xf32>
    %111 = vector.broadcast %92 : vector<7x1xf32> to vector<7x512xf32>
    %112 = vector.broadcast %33 : vector<1x512xf32> to vector<7x512xf32>
    %113 = arith.mulf %111, %112 : vector<7x512xf32>
    %114 = arith.addf %110, %113 : vector<7x512xf32>
    %115 = vector.broadcast %93 : vector<7x1xf32> to vector<7x512xf32>
    %116 = vector.broadcast %34 : vector<1x512xf32> to vector<7x512xf32>
    %117 = arith.mulf %115, %116 : vector<7x512xf32>
    %118 = arith.addf %114, %117 : vector<7x512xf32>
    %119 = vector.broadcast %94 : vector<7x1xf32> to vector<7x512xf32>
    %120 = vector.broadcast %35 : vector<1x512xf32> to vector<7x512xf32>
    %121 = arith.mulf %119, %120 : vector<7x512xf32>
    %122 = arith.addf %118, %121 : vector<7x512xf32>
    %123 = vector.broadcast %95 : vector<7x1xf32> to vector<7x512xf32>
    %124 = vector.broadcast %36 : vector<1x512xf32> to vector<7x512xf32>
    %125 = arith.mulf %123, %124 : vector<7x512xf32>
    %126 = arith.addf %122, %125 : vector<7x512xf32>
    %127 = arith.addf %87, %126 : vector<7x512xf32>
    %cst_12 = arith.constant dense<0xFF800000> : vector<512xf32>
    %128 = vector.multi_reduction <maximumf>, %127, %cst_12 [0] : vector<7x512xf32> to vector<512xf32>
    %129 = vector.shape_cast %128 : vector<512xf32> to vector<1x512xf32>
    %130 = tpu.iota {dimensions = array<i32: 0>} : vector<7x512xi32>
    %131 = arith.sitofp %130 : vector<7x512xi32> to vector<7x512xf32>
    %132 = vector.broadcast %129 : vector<1x512xf32> to vector<7x512xf32>
    %133 = arith.cmpf oge, %127, %132 : vector<7x512xf32>
    %cst_13 = arith.constant 7.000000e+00 : f32
    %134 = vector.broadcast %cst_13 : f32 to vector<7x512xf32>
    %135 = arith.select %133, %131, %134 : vector<7x512xi1>, vector<7x512xf32>
    %cst_14 = arith.constant dense<0x7F800000> : vector<512xf32>
    %136 = vector.multi_reduction <minimumf>, %135, %cst_14 [0] : vector<7x512xf32> to vector<512xf32>
    %137 = vector.shape_cast %136 : vector<512xf32> to vector<1x512xf32>
    %138 = vector.broadcast %137 : vector<1x512xf32> to vector<7x512xf32>
    %139 = arith.cmpf oeq, %131, %138 : vector<7x512xf32>
    %140 = arith.extui %139 : vector<7x512xi1> to vector<7x512xi32>
    %141 = arith.sitofp %140 : vector<7x512xi32> to vector<7x512xf32>
    %142 = vector.extract_strided_slice %141 {offsets = [3, 0], sizes = [1, 512], strides = [1, 1]} : vector<7x512xf32> to vector<1x512xf32>
    %143 = vector.extract_strided_slice %141 {offsets = [4, 0], sizes = [1, 512], strides = [1, 1]} : vector<7x512xf32> to vector<1x512xf32>
    %144 = arith.maximumf %142, %143 : vector<1x512xf32>
    %145 = vector.extract_strided_slice %141 {offsets = [6, 0], sizes = [1, 512], strides = [1, 1]} : vector<7x512xf32> to vector<1x512xf32>
    %146 = arith.maximumf %144, %145 : vector<1x512xf32>
    %147 = vector.extract_strided_slice %141 {offsets = [0, 0], sizes = [1, 512], strides = [1, 1]} : vector<7x512xf32> to vector<1x512xf32>
    %148 = vector.extract_strided_slice %141 {offsets = [1, 0], sizes = [1, 512], strides = [1, 1]} : vector<7x512xf32> to vector<1x512xf32>
    %149 = arith.maximumf %147, %148 : vector<1x512xf32>
    %150 = vector.extract_strided_slice %141 {offsets = [3, 0], sizes = [1, 512], strides = [1, 1]} : vector<7x512xf32> to vector<1x512xf32>
    %151 = arith.maximumf %149, %150 : vector<1x512xf32>
    %152 = vector.extract_strided_slice %141 {offsets = [4, 0], sizes = [1, 512], strides = [1, 1]} : vector<7x512xf32> to vector<1x512xf32>
    %153 = arith.maximumf %151, %152 : vector<1x512xf32>
    %154 = vector.extract_strided_slice %141 {offsets = [1, 0], sizes = [1, 512], strides = [1, 1]} : vector<7x512xf32> to vector<1x512xf32>
    %155 = vector.extract_strided_slice %141 {offsets = [2, 0], sizes = [1, 512], strides = [1, 1]} : vector<7x512xf32> to vector<1x512xf32>
    %156 = arith.maximumf %154, %155 : vector<1x512xf32>
    %157 = vector.extract_strided_slice %141 {offsets = [3, 0], sizes = [1, 512], strides = [1, 1]} : vector<7x512xf32> to vector<1x512xf32>
    %158 = arith.maximumf %156, %157 : vector<1x512xf32>
    %159 = tpu.concatenate %146, %153, %158 in 0 : vector<1x512xf32>, vector<1x512xf32>, vector<1x512xf32> -> vector<3x512xf32>
    %160 = vector.extract_strided_slice %58 {offsets = [0, 0], sizes = [10, 8], strides = [1, 1]} : vector<14x8xf32> to vector<10x8xf32>
    %161 = vector.broadcast %22 : vector<10x1xf32> to vector<10x8xf32>
    %162 = vector.broadcast %59 : vector<1x8xf32> to vector<10x8xf32>
    %163 = arith.mulf %161, %162 : vector<10x8xf32>
    %164 = vector.broadcast %23 : vector<10x1xf32> to vector<10x8xf32>
    %165 = vector.broadcast %60 : vector<1x8xf32> to vector<10x8xf32>
    %166 = arith.mulf %164, %165 : vector<10x8xf32>
    %167 = arith.addf %163, %166 : vector<10x8xf32>
    %168 = vector.broadcast %24 : vector<10x1xf32> to vector<10x8xf32>
    %169 = vector.broadcast %61 : vector<1x8xf32> to vector<10x8xf32>
    %170 = arith.mulf %168, %169 : vector<10x8xf32>
    %171 = arith.addf %167, %170 : vector<10x8xf32>
    %172 = vector.broadcast %25 : vector<10x1xf32> to vector<10x8xf32>
    %173 = vector.broadcast %62 : vector<1x8xf32> to vector<10x8xf32>
    %174 = arith.mulf %172, %173 : vector<10x8xf32>
    %175 = arith.addf %171, %174 : vector<10x8xf32>
    %176 = arith.addf %160, %175 : vector<10x8xf32>
    %cst_15 = arith.constant dense<0xFF800000> : vector<8xf32>
    %177 = vector.multi_reduction <maximumf>, %176, %cst_15 [0] : vector<10x8xf32> to vector<8xf32>
    %178 = vector.shape_cast %177 : vector<8xf32> to vector<1x8xf32>
    %179 = tpu.iota {dimensions = array<i32: 0>} : vector<10x8xi32>
    %180 = arith.sitofp %179 : vector<10x8xi32> to vector<10x8xf32>
    %181 = vector.broadcast %178 : vector<1x8xf32> to vector<10x8xf32>
    %182 = arith.cmpf oge, %176, %181 : vector<10x8xf32>
    %cst_16 = arith.constant 1.000000e+01 : f32
    %183 = vector.broadcast %cst_16 : f32 to vector<10x8xf32>
    %184 = arith.select %182, %180, %183 : vector<10x8xi1>, vector<10x8xf32>
    %cst_17 = arith.constant dense<0x7F800000> : vector<8xf32>
    %185 = vector.multi_reduction <minimumf>, %184, %cst_17 [0] : vector<10x8xf32> to vector<8xf32>
    %186 = vector.shape_cast %185 : vector<8xf32> to vector<1x8xf32>
    %187 = vector.broadcast %186 : vector<1x8xf32> to vector<10x8xf32>
    %188 = arith.cmpf oeq, %180, %187 : vector<10x8xf32>
    %189 = arith.extui %188 : vector<10x8xi1> to vector<10x8xi32>
    %190 = arith.sitofp %189 : vector<10x8xi32> to vector<10x8xf32>
    %c0_18 = arith.constant 0 : index
    %c0_19 = arith.constant 0 : index
    %c0_20 = arith.constant 0 : index
    %191 = vector.load %arg2[%c0_18, %c0_19, %c0_20] : memref<3x3x512xf32, #tpu.memory_space<vmem>>, vector<1x3x512xf32>
    %192 = vector.shape_cast %191 : vector<1x3x512xf32> to vector<3x512xf32>
    %193 = vector.shape_cast %159 : vector<3x512xf32> to vector<1x3x512xf32>
    tpu.vector_store %arg2[%c0_18, %c0_19, %c0_20], %193 {strides = array<i32>} : memref<3x3x512xf32, #tpu.memory_space<vmem>>, vector<1x3x512xf32>,
    %c0_21 = arith.constant 0 : index
    %c0_22 = arith.constant 0 : index
    %c0_23 = arith.constant 0 : index
    %194 = vector.load %arg3[%c0_21, %c0_22, %c0_23] : memref<3x10x8xf32, #tpu.memory_space<vmem>>, vector<1x10x8xf32>
    %195 = vector.shape_cast %194 : vector<1x10x8xf32> to vector<10x8xf32>
    %196 = vector.shape_cast %190 : vector<10x8xf32> to vector<1x10x8xf32>
    tpu.vector_store %arg3[%c0_21, %c0_22, %c0_23], %196 {strides = array<i32>} : memref<3x10x8xf32, #tpu.memory_space<vmem>>, vector<1x10x8xf32>,
    %cst_24 = arith.constant dense<0.000000e+00> : vector<3x8xf32>
    %197 = tpu.matmul %159, %1, %cst_24 {dimension_numbers = #tpu.dot_dimension_numbers<[1], [1], [0], [0], [0, 0, 1, 0], [], []>} : vector<3x512xf32>, vector<8x512xf32>, vector<3x8xf32> -> vector<3x8xf32>
    %cst_25 = arith.constant 1.562500e-02 : f32
    %198 = vector.broadcast %cst_25 : f32 to vector<3x8xf32>
    %199 = arith.mulf %197, %198 : vector<3x8xf32>
    %200 = vector.extract_strided_slice %199 {offsets = [0, 0], sizes = [1, 8], strides = [1, 1]} : vector<3x8xf32> to vector<1x8xf32>
    %201 = vector.extract_strided_slice %199 {offsets = [1, 0], sizes = [1, 8], strides = [1, 1]} : vector<3x8xf32> to vector<1x8xf32>
    %202 = vector.extract_strided_slice %199 {offsets = [2, 0], sizes = [1, 8], strides = [1, 1]} : vector<3x8xf32> to vector<1x8xf32>
    %203 = vector.broadcast %26 : vector<14x1xf32> to vector<14x8xf32>
    %204 = vector.broadcast %200 : vector<1x8xf32> to vector<14x8xf32>
    %205 = arith.mulf %203, %204 : vector<14x8xf32>
    %206 = vector.broadcast %27 : vector<14x1xf32> to vector<14x8xf32>
    %207 = vector.broadcast %201 : vector<1x8xf32> to vector<14x8xf32>
    %208 = arith.mulf %206, %207 : vector<14x8xf32>
    %209 = arith.addf %205, %208 : vector<14x8xf32>
    %210 = vector.broadcast %28 : vector<14x1xf32> to vector<14x8xf32>
    %211 = vector.broadcast %202 : vector<1x8xf32> to vector<14x8xf32>
    %212 = arith.mulf %210, %211 : vector<14x8xf32>
    %213 = arith.addf %209, %212 : vector<14x8xf32>
    %214 = vector.broadcast %7 : vector<14x1xf32> to vector<14x8xf32>
    %215 = arith.addf %213, %214 : vector<14x8xf32>
    %216 = vector.extract_strided_slice %215 {offsets = [10, 0], sizes = [4, 8], strides = [1, 1]} : vector<14x8xf32> to vector<4x8xf32>
    %cst_26 = arith.constant dense<0xFF800000> : vector<8xf32>
    %217 = vector.multi_reduction <maximumf>, %216, %cst_26 [0] : vector<4x8xf32> to vector<8xf32>
    %218 = vector.shape_cast %217 : vector<8xf32> to vector<1x8xf32>
    %219 = tpu.iota {dimensions = array<i32: 0>} : vector<4x8xi32>
    %220 = arith.sitofp %219 : vector<4x8xi32> to vector<4x8xf32>
    %221 = vector.broadcast %218 : vector<1x8xf32> to vector<4x8xf32>
    %222 = arith.cmpf oge, %216, %221 : vector<4x8xf32>
    %cst_27 = arith.constant 4.000000e+00 : f32
    %223 = vector.broadcast %cst_27 : f32 to vector<4x8xf32>
    %224 = arith.select %222, %220, %223 : vector<4x8xi1>, vector<4x8xf32>
    %cst_28 = arith.constant dense<0x7F800000> : vector<8xf32>
    %225 = vector.multi_reduction <minimumf>, %224, %cst_28 [0] : vector<4x8xf32> to vector<8xf32>
    %226 = vector.shape_cast %225 : vector<8xf32> to vector<1x8xf32>
    %227 = vector.broadcast %226 : vector<1x8xf32> to vector<4x8xf32>
    %228 = arith.cmpf oeq, %220, %227 : vector<4x8xf32>
    %229 = arith.extui %228 : vector<4x8xi1> to vector<4x8xi32>
    %230 = arith.sitofp %229 : vector<4x8xi32> to vector<4x8xf32>
    %231 = vector.extract_strided_slice %230 {offsets = [0, 0], sizes = [1, 8], strides = [1, 1]} : vector<4x8xf32> to vector<1x8xf32>
    %232 = vector.extract_strided_slice %230 {offsets = [1, 0], sizes = [1, 8], strides = [1, 1]} : vector<4x8xf32> to vector<1x8xf32>
    %233 = vector.extract_strided_slice %230 {offsets = [2, 0], sizes = [1, 8], strides = [1, 1]} : vector<4x8xf32> to vector<1x8xf32>
    %234 = vector.extract_strided_slice %230 {offsets = [3, 0], sizes = [1, 8], strides = [1, 1]} : vector<4x8xf32> to vector<1x8xf32>
    %235 = vector.broadcast %18 : vector<7x1xf32> to vector<7x8xf32>
    %236 = vector.broadcast %231 : vector<1x8xf32> to vector<7x8xf32>
    %237 = arith.mulf %235, %236 : vector<7x8xf32>
    %238 = vector.broadcast %19 : vector<7x1xf32> to vector<7x8xf32>
    %239 = vector.broadcast %232 : vector<1x8xf32> to vector<7x8xf32>
    %240 = arith.mulf %238, %239 : vector<7x8xf32>
    %241 = arith.addf %237, %240 : vector<7x8xf32>
    %242 = vector.broadcast %20 : vector<7x1xf32> to vector<7x8xf32>
    %243 = vector.broadcast %233 : vector<1x8xf32> to vector<7x8xf32>
    %244 = arith.mulf %242, %243 : vector<7x8xf32>
    %245 = arith.addf %241, %244 : vector<7x8xf32>
    %246 = vector.broadcast %21 : vector<7x1xf32> to vector<7x8xf32>
    %247 = vector.broadcast %234 : vector<1x8xf32> to vector<7x8xf32>
    %248 = arith.mulf %246, %247 : vector<7x8xf32>
    %249 = arith.addf %245, %248 : vector<7x8xf32>
    %250 = vector.broadcast %4 : vector<7x1xf32> to vector<7x8xf32>
    %251 = arith.addf %249, %250 : vector<7x8xf32>
    %252 = vector.broadcast %146 : vector<1x512xf32> to vector<7x512xf32>
    %253 = arith.mulf %11, %252 : vector<7x512xf32>
    %254 = vector.broadcast %153 : vector<1x512xf32> to vector<7x512xf32>
    %255 = arith.mulf %14, %254 : vector<7x512xf32>
    %256 = arith.addf %253, %255 : vector<7x512xf32>
    %257 = vector.broadcast %158 : vector<1x512xf32> to vector<7x512xf32>
    %258 = arith.mulf %17, %257 : vector<7x512xf32>
    %259 = arith.addf %256, %258 : vector<7x512xf32>
    %260 = vector.extract_strided_slice %251 {offsets = [0, 0], sizes = [7, 1], strides = [1, 1]} : vector<7x8xf32> to vector<7x1xf32>
    %261 = vector.extract_strided_slice %251 {offsets = [0, 1], sizes = [7, 1], strides = [1, 1]} : vector<7x8xf32> to vector<7x1xf32>
    %262 = vector.extract_strided_slice %251 {offsets = [0, 2], sizes = [7, 1], strides = [1, 1]} : vector<7x8xf32> to vector<7x1xf32>
    %263 = vector.extract_strided_slice %251 {offsets = [0, 3], sizes = [7, 1], strides = [1, 1]} : vector<7x8xf32> to vector<7x1xf32>
    %264 = vector.extract_strided_slice %251 {offsets = [0, 4], sizes = [7, 1], strides = [1, 1]} : vector<7x8xf32> to vector<7x1xf32>
    %265 = vector.extract_strided_slice %251 {offsets = [0, 5], sizes = [7, 1], strides = [1, 1]} : vector<7x8xf32> to vector<7x1xf32>
    %266 = vector.extract_strided_slice %251 {offsets = [0, 6], sizes = [7, 1], strides = [1, 1]} : vector<7x8xf32> to vector<7x1xf32>
    %267 = vector.extract_strided_slice %251 {offsets = [0, 7], sizes = [7, 1], strides = [1, 1]} : vector<7x8xf32> to vector<7x1xf32>
    %268 = vector.broadcast %260 : vector<7x1xf32> to vector<7x512xf32>
    %269 = vector.broadcast %29 : vector<1x512xf32> to vector<7x512xf32>
    %270 = arith.mulf %268, %269 : vector<7x512xf32>
    %271 = vector.broadcast %261 : vector<7x1xf32> to vector<7x512xf32>
    %272 = vector.broadcast %30 : vector<1x512xf32> to vector<7x512xf32>
    %273 = arith.mulf %271, %272 : vector<7x512xf32>
    %274 = arith.addf %270, %273 : vector<7x512xf32>
    %275 = vector.broadcast %262 : vector<7x1xf32> to vector<7x512xf32>
    %276 = vector.broadcast %31 : vector<1x512xf32> to vector<7x512xf32>
    %277 = arith.mulf %275, %276 : vector<7x512xf32>
    %278 = arith.addf %274, %277 : vector<7x512xf32>
    %279 = vector.broadcast %263 : vector<7x1xf32> to vector<7x512xf32>
    %280 = vector.broadcast %32 : vector<1x512xf32> to vector<7x512xf32>
    %281 = arith.mulf %279, %280 : vector<7x512xf32>
    %282 = arith.addf %278, %281 : vector<7x512xf32>
    %283 = vector.broadcast %264 : vector<7x1xf32> to vector<7x512xf32>
    %284 = vector.broadcast %33 : vector<1x512xf32> to vector<7x512xf32>
    %285 = arith.mulf %283, %284 : vector<7x512xf32>
    %286 = arith.addf %282, %285 : vector<7x512xf32>
    %287 = vector.broadcast %265 : vector<7x1xf32> to vector<7x512xf32>
    %288 = vector.broadcast %34 : vector<1x512xf32> to vector<7x512xf32>
    %289 = arith.mulf %287, %288 : vector<7x512xf32>
    %290 = arith.addf %286, %289 : vector<7x512xf32>
    %291 = vector.broadcast %266 : vector<7x1xf32> to vector<7x512xf32>
    %292 = vector.broadcast %35 : vector<1x512xf32> to vector<7x512xf32>
    %293 = arith.mulf %291, %292 : vector<7x512xf32>
    %294 = arith.addf %290, %293 : vector<7x512xf32>
    %295 = vector.broadcast %267 : vector<7x1xf32> to vector<7x512xf32>
    %296 = vector.broadcast %36 : vector<1x512xf32> to vector<7x512xf32>
    %297 = arith.mulf %295, %296 : vector<7x512xf32>
    %298 = arith.addf %294, %297 : vector<7x512xf32>
    %299 = arith.addf %259, %298 : vector<7x512xf32>
    %cst_29 = arith.constant dense<0xFF800000> : vector<512xf32>
    %300 = vector.multi_reduction <maximumf>, %299, %cst_29 [0] : vector<7x512xf32> to vector<512xf32>
    %301 = vector.shape_cast %300 : vector<512xf32> to vector<1x512xf32>
    %302 = tpu.iota {dimensions = array<i32: 0>} : vector<7x512xi32>
    %303 = arith.sitofp %302 : vector<7x512xi32> to vector<7x512xf32>
    %304 = vector.broadcast %301 : vector<1x512xf32> to vector<7x512xf32>
    %305 = arith.cmpf oge, %299, %304 : vector<7x512xf32>
    %cst_30 = arith.constant 7.000000e+00 : f32
    %306 = vector.broadcast %cst_30 : f32 to vector<7x512xf32>
    %307 = arith.select %305, %303, %306 : vector<7x512xi1>, vector<7x512xf32>
    %cst_31 = arith.constant dense<0x7F800000> : vector<512xf32>
    %308 = vector.multi_reduction <minimumf>, %307, %cst_31 [0] : vector<7x512xf32> to vector<512xf32>
    %309 = vector.shape_cast %308 : vector<512xf32> to vector<1x512xf32>
    %310 = vector.broadcast %309 : vector<1x512xf32> to vector<7x512xf32>
    %311 = arith.cmpf oeq, %303, %310 : vector<7x512xf32>
    %312 = arith.extui %311 : vector<7x512xi1> to vector<7x512xi32>
    %313 = arith.sitofp %312 : vector<7x512xi32> to vector<7x512xf32>
    %314 = vector.extract_strided_slice %313 {offsets = [3, 0], sizes = [1, 512], strides = [1, 1]} : vector<7x512xf32> to vector<1x512xf32>
    %315 = vector.extract_strided_slice %313 {offsets = [4, 0], sizes = [1, 512], strides = [1, 1]} : vector<7x512xf32> to vector<1x512xf32>
    %316 = arith.maximumf %314, %315 : vector<1x512xf32>
    %317 = vector.extract_strided_slice %313 {offsets = [6, 0], sizes = [1, 512], strides = [1, 1]} : vector<7x512xf32> to vector<1x512xf32>
    %318 = arith.maximumf %316, %317 : vector<1x512xf32>
    %319 = vector.extract_strided_slice %313 {offsets = [0, 0], sizes = [1, 512], strides = [1, 1]} : vector<7x512xf32> to vector<1x512xf32>
    %320 = vector.extract_strided_slice %313 {offsets = [1, 0], sizes = [1, 512], strides = [1, 1]} : vector<7x512xf32> to vector<1x512xf32>
    %321 = arith.maximumf %319, %320 : vector<1x512xf32>
    %322 = vector.extract_strided_slice %313 {offsets = [3, 0], sizes = [1, 512], strides = [1, 1]} : vector<7x512xf32> to vector<1x512xf32>
    %323 = arith.maximumf %321, %322 : vector<1x512xf32>
    %324 = vector.extract_strided_slice %313 {offsets = [4, 0], sizes = [1, 512], strides = [1, 1]} : vector<7x512xf32> to vector<1x512xf32>
    %325 = arith.maximumf %323, %324 : vector<1x512xf32>
    %326 = vector.extract_strided_slice %313 {offsets = [1, 0], sizes = [1, 512], strides = [1, 1]} : vector<7x512xf32> to vector<1x512xf32>
    %327 = vector.extract_strided_slice %313 {offsets = [2, 0], sizes = [1, 512], strides = [1, 1]} : vector<7x512xf32> to vector<1x512xf32>
    %328 = arith.maximumf %326, %327 : vector<1x512xf32>
    %329 = vector.extract_strided_slice %313 {offsets = [3, 0], sizes = [1, 512], strides = [1, 1]} : vector<7x512xf32> to vector<1x512xf32>
    %330 = arith.maximumf %328, %329 : vector<1x512xf32>
    %331 = tpu.concatenate %318, %325, %330 in 0 : vector<1x512xf32>, vector<1x512xf32>, vector<1x512xf32> -> vector<3x512xf32>
    %332 = vector.extract_strided_slice %215 {offsets = [0, 0], sizes = [10, 8], strides = [1, 1]} : vector<14x8xf32> to vector<10x8xf32>
    %333 = vector.broadcast %22 : vector<10x1xf32> to vector<10x8xf32>
    %334 = vector.broadcast %231 : vector<1x8xf32> to vector<10x8xf32>
    %335 = arith.mulf %333, %334 : vector<10x8xf32>
    %336 = vector.broadcast %23 : vector<10x1xf32> to vector<10x8xf32>
    %337 = vector.broadcast %232 : vector<1x8xf32> to vector<10x8xf32>
    %338 = arith.mulf %336, %337 : vector<10x8xf32>
    %339 = arith.addf %335, %338 : vector<10x8xf32>
    %340 = vector.broadcast %24 : vector<10x1xf32> to vector<10x8xf32>
    %341 = vector.broadcast %233 : vector<1x8xf32> to vector<10x8xf32>
    %342 = arith.mulf %340, %341 : vector<10x8xf32>
    %343 = arith.addf %339, %342 : vector<10x8xf32>
    %344 = vector.broadcast %25 : vector<10x1xf32> to vector<10x8xf32>
    %345 = vector.broadcast %234 : vector<1x8xf32> to vector<10x8xf32>
    %346 = arith.mulf %344, %345 : vector<10x8xf32>
    %347 = arith.addf %343, %346 : vector<10x8xf32>
    %348 = arith.addf %332, %347 : vector<10x8xf32>
    %cst_32 = arith.constant dense<0xFF800000> : vector<8xf32>
    %349 = vector.multi_reduction <maximumf>, %348, %cst_32 [0] : vector<10x8xf32> to vector<8xf32>
    %350 = vector.shape_cast %349 : vector<8xf32> to vector<1x8xf32>
    %351 = tpu.iota {dimensions = array<i32: 0>} : vector<10x8xi32>
    %352 = arith.sitofp %351 : vector<10x8xi32> to vector<10x8xf32>
    %353 = vector.broadcast %350 : vector<1x8xf32> to vector<10x8xf32>
    %354 = arith.cmpf oge, %348, %353 : vector<10x8xf32>
    %cst_33 = arith.constant 1.000000e+01 : f32
    %355 = vector.broadcast %cst_33 : f32 to vector<10x8xf32>
    %356 = arith.select %354, %352, %355 : vector<10x8xi1>, vector<10x8xf32>
    %cst_34 = arith.constant dense<0x7F800000> : vector<8xf32>
    %357 = vector.multi_reduction <minimumf>, %356, %cst_34 [0] : vector<10x8xf32> to vector<8xf32>
    %358 = vector.shape_cast %357 : vector<8xf32> to vector<1x8xf32>
    %359 = vector.broadcast %358 : vector<1x8xf32> to vector<10x8xf32>
    %360 = arith.cmpf oeq, %352, %359 : vector<10x8xf32>
    %361 = arith.extui %360 : vector<10x8xi1> to vector<10x8xi32>
    %362 = arith.sitofp %361 : vector<10x8xi32> to vector<10x8xf32>
    %c1 = arith.constant 1 : index
    %c0_35 = arith.constant 0 : index
    %c0_36 = arith.constant 0 : index
    %363 = vector.load %arg2[%c1, %c0_35, %c0_36] : memref<3x3x512xf32, #tpu.memory_space<vmem>>, vector<1x3x512xf32>
    %364 = vector.shape_cast %363 : vector<1x3x512xf32> to vector<3x512xf32>
    %365 = vector.shape_cast %331 : vector<3x512xf32> to vector<1x3x512xf32>
    tpu.vector_store %arg2[%c1, %c0_35, %c0_36], %365 {strides = array<i32>} : memref<3x3x512xf32, #tpu.memory_space<vmem>>, vector<1x3x512xf32>,
    %c1_37 = arith.constant 1 : index
    %c0_38 = arith.constant 0 : index
    %c0_39 = arith.constant 0 : index
    %366 = vector.load %arg3[%c1_37, %c0_38, %c0_39] : memref<3x10x8xf32, #tpu.memory_space<vmem>>, vector<1x10x8xf32>
    %367 = vector.shape_cast %366 : vector<1x10x8xf32> to vector<10x8xf32>
    %368 = vector.shape_cast %362 : vector<10x8xf32> to vector<1x10x8xf32>
    tpu.vector_store %arg3[%c1_37, %c0_38, %c0_39], %368 {strides = array<i32>} : memref<3x10x8xf32, #tpu.memory_space<vmem>>, vector<1x10x8xf32>,
    %cst_40 = arith.constant dense<0.000000e+00> : vector<3x8xf32>
    %369 = tpu.matmul %331, %1, %cst_40 {dimension_numbers = #tpu.dot_dimension_numbers<[1], [1], [0], [0], [0, 0, 1, 0], [], []>} : vector<3x512xf32>, vector<8x512xf32>, vector<3x8xf32> -> vector<3x8xf32>
    %cst_41 = arith.constant 1.562500e-02 : f32
    %370 = vector.broadcast %cst_41 : f32 to vector<3x8xf32>
    %371 = arith.mulf %369, %370 : vector<3x8xf32>
    %372 = vector.extract_strided_slice %371 {offsets = [0, 0], sizes = [1, 8], strides = [1, 1]} : vector<3x8xf32> to vector<1x8xf32>
    %373 = vector.extract_strided_slice %371 {offsets = [1, 0], sizes = [1, 8], strides = [1, 1]} : vector<3x8xf32> to vector<1x8xf32>
    %374 = vector.extract_strided_slice %371 {offsets = [2, 0], sizes = [1, 8], strides = [1, 1]} : vector<3x8xf32> to vector<1x8xf32>
    %375 = vector.broadcast %26 : vector<14x1xf32> to vector<14x8xf32>
    %376 = vector.broadcast %372 : vector<1x8xf32> to vector<14x8xf32>
    %377 = arith.mulf %375, %376 : vector<14x8xf32>
    %378 = vector.broadcast %27 : vector<14x1xf32> to vector<14x8xf32>
    %379 = vector.broadcast %373 : vector<1x8xf32> to vector<14x8xf32>
    %380 = arith.mulf %378, %379 : vector<14x8xf32>
    %381 = arith.addf %377, %380 : vector<14x8xf32>
    %382 = vector.broadcast %28 : vector<14x1xf32> to vector<14x8xf32>
    %383 = vector.broadcast %374 : vector<1x8xf32> to vector<14x8xf32>
    %384 = arith.mulf %382, %383 : vector<14x8xf32>
    %385 = arith.addf %381, %384 : vector<14x8xf32>
    %386 = vector.broadcast %7 : vector<14x1xf32> to vector<14x8xf32>
    %387 = arith.addf %385, %386 : vector<14x8xf32>
    %388 = vector.extract_strided_slice %387 {offsets = [10, 0], sizes = [4, 8], strides = [1, 1]} : vector<14x8xf32> to vector<4x8xf32>
    %cst_42 = arith.constant dense<0xFF800000> : vector<8xf32>
    %389 = vector.multi_reduction <maximumf>, %388, %cst_42 [0] : vector<4x8xf32> to vector<8xf32>
    %390 = vector.shape_cast %389 : vector<8xf32> to vector<1x8xf32>
    %391 = tpu.iota {dimensions = array<i32: 0>} : vector<4x8xi32>
    %392 = arith.sitofp %391 : vector<4x8xi32> to vector<4x8xf32>
    %393 = vector.broadcast %390 : vector<1x8xf32> to vector<4x8xf32>
    %394 = arith.cmpf oge, %388, %393 : vector<4x8xf32>
    %cst_43 = arith.constant 4.000000e+00 : f32
    %395 = vector.broadcast %cst_43 : f32 to vector<4x8xf32>
    %396 = arith.select %394, %392, %395 : vector<4x8xi1>, vector<4x8xf32>
    %cst_44 = arith.constant dense<0x7F800000> : vector<8xf32>
    %397 = vector.multi_reduction <minimumf>, %396, %cst_44 [0] : vector<4x8xf32> to vector<8xf32>
    %398 = vector.shape_cast %397 : vector<8xf32> to vector<1x8xf32>
    %399 = vector.broadcast %398 : vector<1x8xf32> to vector<4x8xf32>
    %400 = arith.cmpf oeq, %392, %399 : vector<4x8xf32>
    %401 = arith.extui %400 : vector<4x8xi1> to vector<4x8xi32>
    %402 = arith.sitofp %401 : vector<4x8xi32> to vector<4x8xf32>
    %403 = vector.extract_strided_slice %402 {offsets = [0, 0], sizes = [1, 8], strides = [1, 1]} : vector<4x8xf32> to vector<1x8xf32>
    %404 = vector.extract_strided_slice %402 {offsets = [1, 0], sizes = [1, 8], strides = [1, 1]} : vector<4x8xf32> to vector<1x8xf32>
    %405 = vector.extract_strided_slice %402 {offsets = [2, 0], sizes = [1, 8], strides = [1, 1]} : vector<4x8xf32> to vector<1x8xf32>
    %406 = vector.extract_strided_slice %402 {offsets = [3, 0], sizes = [1, 8], strides = [1, 1]} : vector<4x8xf32> to vector<1x8xf32>
    %407 = vector.broadcast %18 : vector<7x1xf32> to vector<7x8xf32>
    %408 = vector.broadcast %403 : vector<1x8xf32> to vector<7x8xf32>
    %409 = arith.mulf %407, %408 : vector<7x8xf32>
    %410 = vector.broadcast %19 : vector<7x1xf32> to vector<7x8xf32>
    %411 = vector.broadcast %404 : vector<1x8xf32> to vector<7x8xf32>
    %412 = arith.mulf %410, %411 : vector<7x8xf32>
    %413 = arith.addf %409, %412 : vector<7x8xf32>
    %414 = vector.broadcast %20 : vector<7x1xf32> to vector<7x8xf32>
    %415 = vector.broadcast %405 : vector<1x8xf32> to vector<7x8xf32>
    %416 = arith.mulf %414, %415 : vector<7x8xf32>
    %417 = arith.addf %413, %416 : vector<7x8xf32>
    %418 = vector.broadcast %21 : vector<7x1xf32> to vector<7x8xf32>
    %419 = vector.broadcast %406 : vector<1x8xf32> to vector<7x8xf32>
    %420 = arith.mulf %418, %419 : vector<7x8xf32>
    %421 = arith.addf %417, %420 : vector<7x8xf32>
    %422 = vector.broadcast %4 : vector<7x1xf32> to vector<7x8xf32>
    %423 = arith.addf %421, %422 : vector<7x8xf32>
    %424 = vector.broadcast %318 : vector<1x512xf32> to vector<7x512xf32>
    %425 = arith.mulf %11, %424 : vector<7x512xf32>
    %426 = vector.broadcast %325 : vector<1x512xf32> to vector<7x512xf32>
    %427 = arith.mulf %14, %426 : vector<7x512xf32>
    %428 = arith.addf %425, %427 : vector<7x512xf32>
    %429 = vector.broadcast %330 : vector<1x512xf32> to vector<7x512xf32>
    %430 = arith.mulf %17, %429 : vector<7x512xf32>
    %431 = arith.addf %428, %430 : vector<7x512xf32>
    %432 = vector.extract_strided_slice %423 {offsets = [0, 0], sizes = [7, 1], strides = [1, 1]} : vector<7x8xf32> to vector<7x1xf32>
    %433 = vector.extract_strided_slice %423 {offsets = [0, 1], sizes = [7, 1], strides = [1, 1]} : vector<7x8xf32> to vector<7x1xf32>
    %434 = vector.extract_strided_slice %423 {offsets = [0, 2], sizes = [7, 1], strides = [1, 1]} : vector<7x8xf32> to vector<7x1xf32>
    %435 = vector.extract_strided_slice %423 {offsets = [0, 3], sizes = [7, 1], strides = [1, 1]} : vector<7x8xf32> to vector<7x1xf32>
    %436 = vector.extract_strided_slice %423 {offsets = [0, 4], sizes = [7, 1], strides = [1, 1]} : vector<7x8xf32> to vector<7x1xf32>
    %437 = vector.extract_strided_slice %423 {offsets = [0, 5], sizes = [7, 1], strides = [1, 1]} : vector<7x8xf32> to vector<7x1xf32>
    %438 = vector.extract_strided_slice %423 {offsets = [0, 6], sizes = [7, 1], strides = [1, 1]} : vector<7x8xf32> to vector<7x1xf32>
    %439 = vector.extract_strided_slice %423 {offsets = [0, 7], sizes = [7, 1], strides = [1, 1]} : vector<7x8xf32> to vector<7x1xf32>
    %440 = vector.broadcast %432 : vector<7x1xf32> to vector<7x512xf32>
    %441 = vector.broadcast %29 : vector<1x512xf32> to vector<7x512xf32>
    %442 = arith.mulf %440, %441 : vector<7x512xf32>
    %443 = vector.broadcast %433 : vector<7x1xf32> to vector<7x512xf32>
    %444 = vector.broadcast %30 : vector<1x512xf32> to vector<7x512xf32>
    %445 = arith.mulf %443, %444 : vector<7x512xf32>
    %446 = arith.addf %442, %445 : vector<7x512xf32>
    %447 = vector.broadcast %434 : vector<7x1xf32> to vector<7x512xf32>
    %448 = vector.broadcast %31 : vector<1x512xf32> to vector<7x512xf32>
    %449 = arith.mulf %447, %448 : vector<7x512xf32>
    %450 = arith.addf %446, %449 : vector<7x512xf32>
    %451 = vector.broadcast %435 : vector<7x1xf32> to vector<7x512xf32>
    %452 = vector.broadcast %32 : vector<1x512xf32> to vector<7x512xf32>
    %453 = arith.mulf %451, %452 : vector<7x512xf32>
    %454 = arith.addf %450, %453 : vector<7x512xf32>
    %455 = vector.broadcast %436 : vector<7x1xf32> to vector<7x512xf32>
    %456 = vector.broadcast %33 : vector<1x512xf32> to vector<7x512xf32>
    %457 = arith.mulf %455, %456 : vector<7x512xf32>
    %458 = arith.addf %454, %457 : vector<7x512xf32>
    %459 = vector.broadcast %437 : vector<7x1xf32> to vector<7x512xf32>
    %460 = vector.broadcast %34 : vector<1x512xf32> to vector<7x512xf32>
    %461 = arith.mulf %459, %460 : vector<7x512xf32>
    %462 = arith.addf %458, %461 : vector<7x512xf32>
    %463 = vector.broadcast %438 : vector<7x1xf32> to vector<7x512xf32>
    %464 = vector.broadcast %35 : vector<1x512xf32> to vector<7x512xf32>
    %465 = arith.mulf %463, %464 : vector<7x512xf32>
    %466 = arith.addf %462, %465 : vector<7x512xf32>
    %467 = vector.broadcast %439 : vector<7x1xf32> to vector<7x512xf32>
    %468 = vector.broadcast %36 : vector<1x512xf32> to vector<7x512xf32>
    %469 = arith.mulf %467, %468 : vector<7x512xf32>
    %470 = arith.addf %466, %469 : vector<7x512xf32>
    %471 = arith.addf %431, %470 : vector<7x512xf32>
    %cst_45 = arith.constant dense<0xFF800000> : vector<512xf32>
    %472 = vector.multi_reduction <maximumf>, %471, %cst_45 [0] : vector<7x512xf32> to vector<512xf32>
    %473 = vector.shape_cast %472 : vector<512xf32> to vector<1x512xf32>
    %474 = tpu.iota {dimensions = array<i32: 0>} : vector<7x512xi32>
    %475 = arith.sitofp %474 : vector<7x512xi32> to vector<7x512xf32>
    %476 = vector.broadcast %473 : vector<1x512xf32> to vector<7x512xf32>
    %477 = arith.cmpf oge, %471, %476 : vector<7x512xf32>
    %cst_46 = arith.constant 7.000000e+00 : f32
    %478 = vector.broadcast %cst_46 : f32 to vector<7x512xf32>
    %479 = arith.select %477, %475, %478 : vector<7x512xi1>, vector<7x512xf32>
    %cst_47 = arith.constant dense<0x7F800000> : vector<512xf32>
    %480 = vector.multi_reduction <minimumf>, %479, %cst_47 [0] : vector<7x512xf32> to vector<512xf32>
    %481 = vector.shape_cast %480 : vector<512xf32> to vector<1x512xf32>
    %482 = vector.broadcast %481 : vector<1x512xf32> to vector<7x512xf32>
    %483 = arith.cmpf oeq, %475, %482 : vector<7x512xf32>
    %484 = arith.extui %483 : vector<7x512xi1> to vector<7x512xi32>
    %485 = arith.sitofp %484 : vector<7x512xi32> to vector<7x512xf32>
    %486 = vector.extract_strided_slice %485 {offsets = [3, 0], sizes = [1, 512], strides = [1, 1]} : vector<7x512xf32> to vector<1x512xf32>
    %487 = vector.extract_strided_slice %485 {offsets = [4, 0], sizes = [1, 512], strides = [1, 1]} : vector<7x512xf32> to vector<1x512xf32>
    %488 = arith.maximumf %486, %487 : vector<1x512xf32>
    %489 = vector.extract_strided_slice %485 {offsets = [6, 0], sizes = [1, 512], strides = [1, 1]} : vector<7x512xf32> to vector<1x512xf32>
    %490 = arith.maximumf %488, %489 : vector<1x512xf32>
    %491 = vector.extract_strided_slice %485 {offsets = [0, 0], sizes = [1, 512], strides = [1, 1]} : vector<7x512xf32> to vector<1x512xf32>
    %492 = vector.extract_strided_slice %485 {offsets = [1, 0], sizes = [1, 512], strides = [1, 1]} : vector<7x512xf32> to vector<1x512xf32>
    %493 = arith.maximumf %491, %492 : vector<1x512xf32>
    %494 = vector.extract_strided_slice %485 {offsets = [3, 0], sizes = [1, 512], strides = [1, 1]} : vector<7x512xf32> to vector<1x512xf32>
    %495 = arith.maximumf %493, %494 : vector<1x512xf32>
    %496 = vector.extract_strided_slice %485 {offsets = [4, 0], sizes = [1, 512], strides = [1, 1]} : vector<7x512xf32> to vector<1x512xf32>
    %497 = arith.maximumf %495, %496 : vector<1x512xf32>
    %498 = vector.extract_strided_slice %485 {offsets = [1, 0], sizes = [1, 512], strides = [1, 1]} : vector<7x512xf32> to vector<1x512xf32>
    %499 = vector.extract_strided_slice %485 {offsets = [2, 0], sizes = [1, 512], strides = [1, 1]} : vector<7x512xf32> to vector<1x512xf32>
    %500 = arith.maximumf %498, %499 : vector<1x512xf32>
    %501 = vector.extract_strided_slice %485 {offsets = [3, 0], sizes = [1, 512], strides = [1, 1]} : vector<7x512xf32> to vector<1x512xf32>
    %502 = arith.maximumf %500, %501 : vector<1x512xf32>
    %503 = tpu.concatenate %490, %497, %502 in 0 : vector<1x512xf32>, vector<1x512xf32>, vector<1x512xf32> -> vector<3x512xf32>
    %504 = vector.extract_strided_slice %387 {offsets = [0, 0], sizes = [10, 8], strides = [1, 1]} : vector<14x8xf32> to vector<10x8xf32>
    %505 = vector.broadcast %22 : vector<10x1xf32> to vector<10x8xf32>
    %506 = vector.broadcast %403 : vector<1x8xf32> to vector<10x8xf32>
    %507 = arith.mulf %505, %506 : vector<10x8xf32>
    %508 = vector.broadcast %23 : vector<10x1xf32> to vector<10x8xf32>
    %509 = vector.broadcast %404 : vector<1x8xf32> to vector<10x8xf32>
    %510 = arith.mulf %508, %509 : vector<10x8xf32>
    %511 = arith.addf %507, %510 : vector<10x8xf32>
    %512 = vector.broadcast %24 : vector<10x1xf32> to vector<10x8xf32>
    %513 = vector.broadcast %405 : vector<1x8xf32> to vector<10x8xf32>
    %514 = arith.mulf %512, %513 : vector<10x8xf32>
    %515 = arith.addf %511, %514 : vector<10x8xf32>
    %516 = vector.broadcast %25 : vector<10x1xf32> to vector<10x8xf32>
    %517 = vector.broadcast %406 : vector<1x8xf32> to vector<10x8xf32>
    %518 = arith.mulf %516, %517 : vector<10x8xf32>
    %519 = arith.addf %515, %518 : vector<10x8xf32>
    %520 = arith.addf %504, %519 : vector<10x8xf32>
    %cst_48 = arith.constant dense<0xFF800000> : vector<8xf32>
    %521 = vector.multi_reduction <maximumf>, %520, %cst_48 [0] : vector<10x8xf32> to vector<8xf32>
    %522 = vector.shape_cast %521 : vector<8xf32> to vector<1x8xf32>
    %523 = tpu.iota {dimensions = array<i32: 0>} : vector<10x8xi32>
    %524 = arith.sitofp %523 : vector<10x8xi32> to vector<10x8xf32>
    %525 = vector.broadcast %522 : vector<1x8xf32> to vector<10x8xf32>
    %526 = arith.cmpf oge, %520, %525 : vector<10x8xf32>
    %cst_49 = arith.constant 1.000000e+01 : f32
    %527 = vector.broadcast %cst_49 : f32 to vector<10x8xf32>
    %528 = arith.select %526, %524, %527 : vector<10x8xi1>, vector<10x8xf32>
    %cst_50 = arith.constant dense<0x7F800000> : vector<8xf32>
    %529 = vector.multi_reduction <minimumf>, %528, %cst_50 [0] : vector<10x8xf32> to vector<8xf32>
    %530 = vector.shape_cast %529 : vector<8xf32> to vector<1x8xf32>
    %531 = vector.broadcast %530 : vector<1x8xf32> to vector<10x8xf32>
    %532 = arith.cmpf oeq, %524, %531 : vector<10x8xf32>
    %533 = arith.extui %532 : vector<10x8xi1> to vector<10x8xi32>
    %534 = arith.sitofp %533 : vector<10x8xi32> to vector<10x8xf32>
    %c2 = arith.constant 2 : index
    %c0_51 = arith.constant 0 : index
    %c0_52 = arith.constant 0 : index
    %535 = vector.load %arg2[%c2, %c0_51, %c0_52] : memref<3x3x512xf32, #tpu.memory_space<vmem>>, vector<1x3x512xf32>
    %536 = vector.shape_cast %535 : vector<1x3x512xf32> to vector<3x512xf32>
    %537 = vector.shape_cast %503 : vector<3x512xf32> to vector<1x3x512xf32>
    tpu.vector_store %arg2[%c2, %c0_51, %c0_52], %537 {strides = array<i32>} : memref<3x3x512xf32, #tpu.memory_space<vmem>>, vector<1x3x512xf32>,
    %c2_53 = arith.constant 2 : index
    %c0_54 = arith.constant 0 : index
    %c0_55 = arith.constant 0 : index
    %538 = vector.load %arg3[%c2_53, %c0_54, %c0_55] : memref<3x10x8xf32, #tpu.memory_space<vmem>>, vector<1x10x8xf32>
    %539 = vector.shape_cast %538 : vector<1x10x8xf32> to vector<10x8xf32>
    %540 = vector.shape_cast %534 : vector<10x8xf32> to vector<1x10x8xf32>
    tpu.vector_store %arg3[%c2_53, %c0_54, %c0_55], %540 {strides = array<i32>} : memref<3x10x8xf32, #tpu.memory_space<vmem>>, vector<1x10x8xf32>,
    return
  }
}

</mosaic_0001>

<bundles_post_ra>
// kernel: eq.1
= control target key start
LH: loop header
LB: loop body
LE: loop exit
PB: predicated region body
PF: predicated region fallthrough
CT: control target
= control target key end

     0   :  { %vm8_vm0 = vcmask 31744   ;;  %vm14_vm1 = vcmask 64544   ;;  %s42_s0 = inlined_call_operand.vmem [shape: s32[2,4], index: 0, kind: input, shape index: {}]   ;;  %s43_s1 = inlined_call_operand.vmem [shape: s32[8], index: 1, kind: output, shape index: {}]  }
   0x1   :  { %v5_v0 = vld [vmem:[%s42_s0] sm:$0x3]  ;;  %s25_s0 = smov 4  }
   0x2   :  { %6 = vst [vmem:[#allocation1] sm:$0x3] %v5_v0 }
   0x9   :  { %v11_v1 = vld [vmem:[#allocation1 + $0x1] sm:$0x1]   ;;  %v7_v2 = vld [vmem:[#allocation1] sm:$0x1]  }
   0xa   :  { %12 = vrot.lane.b32.xlu0 %v11_v1, %s25_s0  ;;  %9 = vst.msk [vmem:[#allocation0] sm:$0x1] %vm8_vm0, %v7_v2  }
  0x7c   :  { %v13_v3 = vpop.permute.xlu0 %12  }
  0x7d   :  { %15 = vst.msk [vmem:[#allocation0] sm:$0x1] %vm14_vm1, %v13_v3  }
  0x84   :  { %v20_v4 = vld [vmem:[#allocation0] sm:$0x1] }
  0x85   :  { %23 = vst [vmem:[%s43_s1] sm:$0x1] %v20_v4 }

// kernel: imagination_core_forward.1
= control target key start
LH: loop header
LB: loop body
LE: loop exit
PB: predicated region body
PF: predicated region fallthrough
CT: control target
= control target key end

     0   :  { %v3151_v0 = vmov 0   ;;  %v3161_v2 = vmov 2   ;;  %v3147_v3 = vmov 1   ;;  %v3159_v4 = vmov 3   ;;  %s3143_s1 = inlined_call_operand.vmem [shape: f32[80,8], index: 1, kind: input, shape index: {}]   ;;  %s3144_s0 = inlined_call_operand.vmem [shape: f32[16,512], index: 0, kind: input, shape index: {}]   ;;  %s3145_s2 = inlined_call_operand.vmem [shape: f32[3,3,512], index: 2, kind: output, shape index: {0}]   ;;  %s3146_s3 = inlined_call_operand.vmem [shape: f32[3,10,8], index: 3, kind: output, shape index: {1}]  }
   0x1   :  { %2111 = vset.pattern.permute.xlu0 %v3151_v0  ;;  %v22_v1 = vld [vmem:[%s3143_s1 + $0x8] sm:$0x7f]  ;;  %2113 = vset.pattern.permute.xlu1 %v3161_v2  ;;  %v23_v5 = vld [vmem:[%s3143_s1 + $0x10] sm:$0x7f]  ;;  %v2198_v6 = vld [vmem:[%s3143_s1] sm:$0x7f]  ;;  %v195_v7 = vlaneseq }
   0x2   :  { %247 = vperm.xlu0 %2111, %v22_v1   ;;  %266 = vperm.xlu1 %2113, %v22_v1   ;;  %v30_v11 = vld [vmem:[%s3143_s1 + $0x48] sm:$0xf]  ;;  %v2254_v25 = vld [vmem:[%s3144_s0 + $0x18] sm:$0x7]  ;;  %v2278_v33 = vld [vmem:[%s3144_s0 + $0x20] sm:$0xff]  ;;  %v3157_v39 = vmov 4  }
   0x3   :  { %v2205_v8 = vshrl.u32 %v195_v7, 7  ;;  %v2249_v24 = vld [vmem:[%s3144_s0 + $0x8] sm:$0x7]  ;;  %178 = vmatprep.mubr.f32.mxu1 %v2254_v25  ;;  %v2270_v31 = vld [vmem:[%s3144_s0 + $0x38] sm:$0xff]  ;;  %v2283_v34 = vld [vmem:[%s3144_s0 + $0x30] sm:$0xff]  ;;  %v3153_v40 = vmov 5  }
   0x4   :  { %108 = vmatprep.mubr.f32.mxu0 %v2249_v24  ;;  %v2265_v29 = vld [vmem:[%s3144_s0 + $0x28] sm:$0xff]  ;;  %144 = vmatprep.subr.mxu1 %v2270_v31  ;;  %v2294_v37 = vld [vmem:[%s3144_s0] sm:$0x7]  ;;  %v2299_v38 = vld [vmem:[%s3144_s0 + $0x10] sm:$0x7]  ;;  %v3155_v41 = vmov 6  }
   0x5   :  { %3244 = vst [vmem:[#allocation2_spill] sm:$0xff] %v2205_v8  ;;  %v2208_v9 = vsub.s32 0, %v2205_v8  ;;  %v2211_v10 = vsub.s32 1, %v2205_v8  ;;  %v2219_v13 = vsub.s32 2, %v2205_v8  ;;  %v2224_v15 = vsub.s32 3, %v2205_v8  ;;  %74 = vmatprep.subr.mxu0 %v2265_v29  ;;  %145 = vmatpush1.xpose.msra.mxu1 %v2283_v34 }
   0x6   :  { %2112 = vset.pattern.permute.xlu0 %v3147_v3  ;;  %2114 = vset.pattern.permute.xlu1 %v3159_v4  ;;  %v3149_v42 = vmov 7   ;;  %v27_v43 = vld [vmem:[%s3143_s1 + $0x30] sm:$0x3f]  ;;  %v29_v44 = vld [vmem:[%s3143_s1 + $0x40] sm:$0x3f]  ;;  %vm584_vm0 = vcmask 1046528  }
   0x7   :  { %256 = vperm.xlu0 %2112, %v22_v1   ;;  %276 = vperm.xlu1 %2114, %v22_v1   ;;  %v2227_v16 = vrot.slane %v30_v11, %v2208_v9  ;;  %v2230_v17 = vrot.slane %v30_v11, %v2211_v10  ;;  %v2233_v18 = vrot.slane %v30_v11, %v2219_v13  ;;  %vm752_vm9 = vcmask 1040384  }
   0x8   :  { %v2236_v19 = vrot.slane %v30_v11, %v2224_v15  ;;  %75 = vmatpush1.xpose.msra.mxu0 %v2278_v33  ;;  %956 = vmatprep.subr.mxu1 %v2270_v31  ;;  %v298_v47 = vrot.slane %v2249_v24, %v2208_v9  ;;  %v306_v48 = vrot.slane %v2254_v25, %v2208_v9  ;;  %vm757_vm10 = vcmask 1041408  }
   0x9   :  { %3245 = vst [vmem:[#allocation3_spill] sm:$0xff] %v2227_v16  ;;  %3246 = vst [vmem:[#allocation4_spill] sm:$0xff] %v2230_v17  ;;  %886 = vmatprep.subr.mxu0 %v2265_v29  ;;  %179 = vmatmul.mubr.f32.vlgmr.msra.gmra.mxu1 %v2299_v38  ;;  %v294_v49 = vrot.slane %v2294_v37, %v2208_v9  ;;  %v302_v50 = vrot.slane %v2299_v38, %v2208_v9  ;;  %vm1021_vm11 = vcmask 62466  }
   0xa   :  { %3247 = vst [vmem:[#allocation5_spill] sm:$0xff] %v2233_v18  ;;  %3248 = vst [vmem:[#allocation6_spill] sm:$0xff] %v2236_v19  ;;  %957 = vmatpush1.xpose.msra.mxu1 %v2283_v34  ;;  %v318_v51 = vrot.slane %v2249_v24, %v2211_v10  ;;  %v326_v52 = vrot.slane %v2254_v25, %v2211_v10  ;;  %v314_v53 = vrot.slane %v2294_v37, %v2211_v10 }
   0xb   :  { %2115 = vset.pattern.permute.xlu1 %v3151_v0  ;;  %2116 = vset.pattern.permute.xlu0 %v3151_v0  ;;  %v322_v54 = vrot.slane %v2299_v38, %v2211_v10  ;;  %v2349_v55 = vrot.slane %v2278_v33, %v2211_v10  ;;  %v2353_v56 = vrot.slane %v2265_v29, %v2211_v10 }
   0xc   :  { %287 = vperm.xlu1 %2115, %v23_v5   ;;  %33 = vperm.xlu0 %2116, %v2198_v6   ;;  %v2357_v57 = vrot.slane %v2283_v34, %v2211_v10  ;;  %v2361_v58 = vrot.slane %v2270_v31, %v2211_v10  ;;  %v2365_v60 = vrot.slane %v2278_v33, %v2208_v9 }
   0xd   :  { %109 = vmatmul.mubr.f32.vlgmr.msra.gmra.mxu0 %v2294_v37  ;;  %1563 = vmatprep.subr.mxu1 %v2270_v31  ;;  %3249 = vst [vmem:[#allocation7_spill] sm:$0xff] %v2349_v55  ;;  %3250 = vst [vmem:[#allocation8_spill] sm:$0xff] %v2353_v56  ;;  %v2369_v61 = vrot.slane %v2265_v29, %v2208_v9  ;;  %v2373_v62 = vrot.slane %v2283_v34, %v2208_v9 }
   0xe   :  { %887 = vmatpush1.xpose.msra.mxu0 %v2278_v33  ;;  %3251 = vst [vmem:[#allocation9_spill] sm:$0xff] %v2357_v57  ;;  %3252 = vst [vmem:[#allocation10_spill] sm:$0xff] %v2361_v58  ;;  %v2377_v63 = vrot.slane %v2270_v31, %v2208_v9 }
   0xf   :  { %1493 = vmatprep.subr.mxu0 %v2265_v29  ;;  %3253 = vst [vmem:[#allocation11_spill] sm:$0xff] %v2365_v60  ;;  %3254 = vst [vmem:[#allocation12_spill] sm:$0xff] %v2369_v61 }
  0x10   :  { %2117 = vset.pattern.permute.xlu1 %v3147_v3  ;;  %3255 = vst [vmem:[#allocation13_spill] sm:$0xff] %v2373_v62  ;;  %3256 = vst [vmem:[#allocation14_spill] sm:$0xff] %v2377_v63 }
  0x11   :  { %37 = vperm.xlu1 %2117, %v2198_v6  }
  0x7d   :  { %v2216_v12 = vpop.permute.xlu0 %247  ;;  %v2221_v14 = vpop.permute.xlu1 %266 }
  0x7e   :  { %v254_v22 = vmul.f32 %v2227_v16, %v2216_v12  ;;  %v273_v26 = vmul.f32 %v2233_v18, %v2221_v14 }
  0x82   :  { %v2238_v20 = vpop.permute.xlu0 %256  ;;  %v2240_v21 = vpop.permute.xlu1 %276 }
  0x83   :  { %v263_v23 = vmul.f32 %v2230_v17, %v2238_v20  ;;  %v283_v28 = vmul.f32 %v2236_v19, %v2240_v21 }
  0x85   :  { %v264_v27 = vadd.f32 %v263_v23, %v254_v22  ;;  %v2393_v22 = vrot.slane %v2278_v33, %v2219_v13  ;;  %v2397_v23 = vrot.slane %v2265_v29, %v2219_v13 }
  0x87   :  { %v274_v30 = vadd.f32 %v273_v26, %v264_v27  ;;  %v2273_v32 = vpop.permute.xlu1 %287  ;;  %v2329_v46 = vpop.permute.xlu0 %33  ;;  %3257 = vst [vmem:[#allocation15_spill] sm:$0xff] %v2393_v22  ;;  %3258 = vst [vmem:[#allocation16_spill] sm:$0xff] %v2397_v23  ;;  %v2401_v26 = vrot.slane %v2283_v34, %v2219_v13  ;;  %v2405_v27 = vrot.slane %v2270_v31, %v2219_v13 }
  0x88   :  { %v2380_v1 = vmul.f32 %v298_v47, %v2329_v46  ;;  %v2383_v5 = vmul.f32 %v306_v48, %v2329_v46  ;;  %v2389_v7 = vmul.f32 %v302_v50, %v2329_v46 }
  0x89   :  { %v284_v35 = vadd.f32 %v283_v28, %v274_v30  ;;  %3259 = vst [vmem:[#allocation17_spill] sm:$0xff] %v2401_v26  ;;  %3260 = vst [vmem:[#allocation18_spill] sm:$0xff] %v2405_v27  ;;  %v2409_v28 = vrot.slane %v2278_v33, %v2224_v15  ;;  %v2413_v30 = vrot.slane %v2265_v29, %v2224_v15 }
  0x8b   :  { %v290_v36 = vadd.f32 %v2273_v32, %v284_v35  ;;  %3261 = vst [vmem:[#allocation19_spill] sm:$0xff] %v2409_v28  ;;  %3262 = vst [vmem:[#allocation20_spill] sm:$0xff] %v2413_v30  ;;  %v2417_v35 = vrot.slane %v2283_v34, %v2224_v15 }
  0x8c   :  { %v2327_v45 = vpop.permute.xlu1 %37 }
  0x8d   :  { %385 = vperm.xlu1 %2117, %v290_v36   ;;  %361 = vperm.xlu0 %2116, %v290_v36   ;;  %3263 = vst [vmem:[#allocation21_spill] sm:$0xff] %v2417_v35  ;;  %v2453_v17 = vmul.f32 %v322_v54, %v2327_v45 }
  0x91   :  { %2118 = vset.pattern.permute.xlu1 %v3161_v2  ;;  %2119 = vset.pattern.permute.xlu0 %v3159_v4 }
  0x92   :  { %413 = vperm.xlu1 %2118, %v290_v36   ;;  %441 = vperm.xlu0 %2119, %v290_v36  }
  0x96   :  { %2121 = vset.pattern.permute.xlu1 %v3157_v39  ;;  %2120 = vset.pattern.permute.xlu0 %v3161_v2  ;;  %v2436_v39 = vmul.f32 %v326_v52, %v2327_v45  ;;  %v502_v52 = vsub.s32 5, %v2205_v8 }
  0x97   :  { %469 = vperm.xlu1 %2121, %v290_v36   ;;  %41 = vperm.xlu0 %2120, %v2198_v6   ;;  %v2386_v6 = vmul.f32 %v294_v49, %v2329_v46 }
  0x9b   :  { %2122 = vset.pattern.permute.xlu1 %v3153_v40  ;;  %2126 = vset.pattern.permute.xlu0 %v3147_v3  ;;  %v2430_v40 = vrot.slane %v2270_v31, %v2224_v15 }
  0x9c   :  { %497 = vperm.xlu1 %2122, %v290_v36   ;;  %206 = vperm.xlu0 %2126, %v27_v43  }
  0x9d   :  { %3264 = vst [vmem:[#allocation22_spill] sm:$0xff] %v2430_v40 }
  0xa0   :  { %2123 = vset.pattern.permute.xlu1 %v3155_v41  ;;  %2129 = vset.pattern.permute.xlu0 %v3151_v0  ;;  %v2433_v41 = vmul.f32 %v318_v51, %v2327_v45 }
  0xa1   :  { %525 = vperm.xlu1 %2123, %v290_v36  }
  0xa5   :  { %2124 = vset.pattern.permute.xlu1 %v3149_v42 }
  0xa6   :  { %553 = vperm.xlu1 %2124, %v290_v36   ;;  %v474_v36 = vsub.s32 4, %v2205_v8 }
  0xa8   :  { %v2446_v18 = vrot.slane %v2278_v33, %v474_v36  ;;  %v2449_v51 = vrot.slane %v2265_v29, %v474_v36 }
  0xaa   :  { %2125 = vset.pattern.permute.xlu1 %v3151_v0  ;;  %3265 = vst [vmem:[#allocation23_spill] sm:$0xff] %v2446_v18  ;;  %3266 = vst [vmem:[#allocation24_spill] sm:$0xff] %v2449_v51 }
  0xab   :  { %192 = vperm.xlu1 %2125, %v27_v43  }
  0xaf   :  { %2127 = vset.pattern.permute.xlu1 %v3161_v2 }
  0xb0   :  { %222 = vperm.xlu1 %2127, %v27_v43  }
  0xb4   :  { %2128 = vset.pattern.permute.xlu1 %v3151_v0 }
  0xb5   :  { %240 = vperm.xlu1 %2128, %v29_v44  }
  0xb9   :  { %2130 = vset.pattern.permute.xlu1 %v3147_v3 }
 0x108   :  { %v386_v59 = vpop.permute.xlu1 %385  ;;  %v362_v11 = vpop.permute.xlu0 %361 }
 0x109   :  { %v404_v43 = vmul.f32 %v2349_v55, %v386_v59  ;;  %v405_v44 = vmul.f32 %v2353_v56, %v386_v59  ;;  %v406_v47 = vmul.f32 %v2357_v57, %v386_v59  ;;  %v407_v48 = vmul.f32 %v2361_v58, %v386_v59 }
 0x10a   :  { %v380_v49 = vmul.f32 %v2365_v60, %v362_v11  ;;  %v381_v50 = vmul.f32 %v2369_v61, %v362_v11  ;;  %v382_v3 = vmul.f32 %v2373_v62, %v362_v11  ;;  %v383_v42 = vmul.f32 %v2377_v63, %v362_v11 }
 0x10b   :  { %v2439_v59 = vmul.f32 %v314_v53, %v2327_v45  ;;  %v350_v61 = vrot.slane %v2254_v25, %v2219_v13  ;;  %v2484_v25 = vrot.slane %v2270_v31, %v502_v52 }
 0x10c   :  { %v408_v53 = vadd.f32 %v404_v43, %v380_v49  ;;  %v409_v16 = vadd.f32 %v405_v44, %v381_v50  ;;  %v411_v63 = vadd.f32 %v407_v48, %v383_v42  ;;  %v530_v42 = vsub.s32 6, %v2205_v8 }
 0x10d   :  { %v414_v0 = vpop.permute.xlu1 %413 }
 0x10e   :  { %v432_v4 = vmul.f32 %v2393_v22, %v414_v0  ;;  %v433_v2 = vmul.f32 %v2397_v23, %v414_v0  ;;  %v434_v11 = vmul.f32 %v2401_v26, %v414_v0  ;;  %v435_v19 = vmul.f32 %v2405_v27, %v414_v0  ;;  %v442_v23 = vpop.permute.xlu0 %441 }
 0x10f   :  { %v410_v22 = vadd.f32 %v406_v47, %v382_v3  ;;  %v2456_v26 = vrot.slane %v2283_v34, %v474_v36  ;;  %v2459_v0 = vrot.slane %v2270_v31, %v474_v36  ;;  %v342_v27 = vrot.slane %v2249_v24, %v2219_v13 }
 0x110   :  { %v436_v54 = vadd.f32 %v432_v4, %v408_v53  ;;  %v437_v60 = vadd.f32 %v433_v2, %v409_v16  ;;  %v439_v44 = vadd.f32 %v435_v19, %v411_v63  ;;  %v2466_v3 = vrot.slane %v2278_v33, %v502_v52 }
 0x111   :  { %3267 = vst [vmem:[#allocation25_spill] sm:$0xff] %v2456_v26  ;;  %3268 = vst [vmem:[#allocation26_spill] sm:$0xff] %v2459_v0  ;;  %v438_v43 = vadd.f32 %v434_v11, %v410_v22  ;;  %v338_v47 = vrot.slane %v2294_v37, %v2219_v13  ;;  %v346_v36 = vrot.slane %v2299_v38, %v2219_v13  ;;  %v558_v37 = vsub.s32 7, %v2205_v8 }
 0x112   :  { %v470_v62 = vpop.permute.xlu1 %469  ;;  %3269 = vst [vmem:[#allocation27_spill] sm:$0xff] %v2466_v3  ;;  %v460_v24 = vmul.f32 %v2409_v28, %v442_v23  ;;  %v461_v48 = vmul.f32 %v2413_v30, %v442_v23  ;;  %v462_v4 = vmul.f32 %v2417_v35, %v442_v23  ;;  %v463_v2 = vmul.f32 %v2430_v40, %v442_v23 }
 0x113   :  { %v2478_v16 = vrot.slane %v2265_v29, %v502_v52  ;;  %v2481_v19 = vrot.slane %v2283_v34, %v502_v52  ;;  %v488_v11 = vmul.f32 %v2446_v18, %v470_v62  ;;  %v489_v23 = vmul.f32 %v2449_v51, %v470_v62 }
 0x114   :  { %v464_v38 = vadd.f32 %v460_v24, %v436_v54  ;;  %v465_v63 = vadd.f32 %v461_v48, %v437_v60  ;;  %v466_v22 = vadd.f32 %v462_v4, %v438_v43  ;;  %v467_v49 = vadd.f32 %v463_v2, %v439_v44  ;;  %v2515_v48 = vpop.permute.xlu0 %41 }
 0x115   :  { %3270 = vst [vmem:[#allocation28_spill] sm:$0xff] %v2478_v16  ;;  %3271 = vst [vmem:[#allocation29_spill] sm:$0xff] %v2481_v19  ;;  %v490_v53 = vmul.f32 %v2456_v26, %v470_v62  ;;  %v491_v40 = vmul.f32 %v2459_v0, %v470_v62  ;;  %v2492_v35 = vrot.slane %v2278_v33, %v530_v42 }
 0x116   :  { %v2495_v52 = vrot.slane %v2265_v29, %v530_v42  ;;  %v2498_v54 = vrot.slane %v2283_v34, %v530_v42  ;;  %v2501_v60 = vrot.slane %v2270_v31, %v530_v42  ;;  %v2504_v43 = vrot.slane %v2278_v33, %v558_v37 }
 0x117   :  { %v498_v50 = vpop.permute.xlu1 %497  ;;  %3272 = vst [vmem:[#allocation30_spill] sm:$0xff] %v2492_v35  ;;  %v2507_v44 = vrot.slane %v2265_v29, %v558_v37  ;;  %v2510_v62 = vrot.slane %v2283_v34, %v558_v37  ;;  %v2513_v24 = vrot.slane %v2270_v31, %v558_v37  ;;  %v492_v26 = vadd.f32 %v488_v11, %v464_v38 }
 0x118   :  { %3273 = vst [vmem:[#allocation31_spill] sm:$0xff] %v2495_v52  ;;  %3274 = vst [vmem:[#allocation32_spill] sm:$0xff] %v2498_v54  ;;  %v516_v4 = vmul.f32 %v2466_v3, %v498_v50  ;;  %v517_v2 = vmul.f32 %v2478_v16, %v498_v50  ;;  %v518_v42 = vmul.f32 %v2481_v19, %v498_v50 }
 0x119   :  { %3275 = vst [vmem:[#allocation33_spill] sm:$0xff] %v2513_v24  ;;  %v519_v0 = vmul.f32 %v2484_v25, %v498_v50  ;;  %v493_v51 = vadd.f32 %v489_v23, %v465_v63  ;;  %v494_v29 = vadd.f32 %v490_v53, %v466_v22  ;;  %v495_v18 = vadd.f32 %v491_v40, %v467_v49 }
 0x11a   :  { %v352_v3 = vmul.f32 %v342_v27, %v2515_v48  ;;  %v354_v16 = vmul.f32 %v350_v61, %v2515_v48  ;;  %v351_v19 = vmul.f32 %v338_v47, %v2515_v48  ;;  %v353_v38 = vmul.f32 %v346_v36, %v2515_v48 }
 0x11b   :  { %v520_v63 = vadd.f32 %v516_v4, %v492_v26  ;;  %v521_v22 = vadd.f32 %v517_v2, %v493_v51  ;;  %v522_v40 = vadd.f32 %v518_v42, %v494_v29  ;;  %v523_v49 = vadd.f32 %v519_v0, %v495_v18 }
 0x11c   :  { %v526_v30 = vpop.permute.xlu1 %525  ;;  %v332_v50 = vadd.f32 %v2433_v41, %v2380_v1  ;;  %v334_v11 = vadd.f32 %v2436_v39, %v2383_v5  ;;  %v333_v61 = vadd.f32 %v2453_v17, %v2389_v7 }
 0x11d   :  { %v544_v28 = vmul.f32 %v2492_v35, %v526_v30  ;;  %v545_v31 = vmul.f32 %v2495_v52, %v526_v30  ;;  %v546_v37 = vmul.f32 %v2498_v54, %v526_v30  ;;  %v547_v58 = vmul.f32 %v2501_v60, %v526_v30 }
 0x11e   :  { %v331_v30 = vadd.f32 %v2439_v59, %v2386_v6  ;;  %v356_v39 = vadd.f32 %v352_v3, %v332_v50  ;;  %v358_v5 = vadd.f32 %v354_v16, %v334_v11  ;;  %v357_v6 = vadd.f32 %v353_v38, %v333_v61 }
 0x11f   :  { %v548_v27 = vadd.f32 %v544_v28, %v520_v63  ;;  %v549_v47 = vadd.f32 %v545_v31, %v521_v22  ;;  %v550_v23 = vadd.f32 %v546_v37, %v522_v40  ;;  %v551_v36 = vadd.f32 %v547_v58, %v523_v49 }
 0x120   :  { %v355_v0 = vadd.f32 %v351_v19, %v331_v30 }
 0x121   :  { %v554_v26 = vpop.permute.xlu1 %553 }
 0x122   :  { %v572_v51 = vmul.f32 %v2504_v43, %v554_v26  ;;  %v573_v18 = vmul.f32 %v2507_v44, %v554_v26  ;;  %v574_v41 = vmul.f32 %v2510_v62, %v554_v26  ;;  %v575_v1 = vmul.f32 %v2513_v24, %v554_v26 }
 0x124   :  { %v576_v59 = vadd.f32 %v572_v51, %v548_v27  ;;  %v577_v53 = vadd.f32 %v573_v18, %v549_v47  ;;  %v578_v17 = vadd.f32 %v574_v41, %v550_v23  ;;  %v579_v7 = vadd.f32 %v575_v1, %v551_v36 }
 0x125   :  { %v2546_v1 = vcvt.s32.f32 %v2205_v8  ;;  %v3299_v8 = vld [vmem:[#allocation13_spill] sm:$0xff] }
 0x126   :  { %v581_v28 = vadd.f32 %v577_v53, %v356_v39  ;;  %v583_v58 = vadd.f32 %v579_v7, %v358_v5  ;;  %v580_v4 = vadd.f32 %v576_v59, %v355_v0  ;;  %v582_v2 = vadd.f32 %v578_v17, %v357_v6 }
 0x127   :  { %3276 = vst [vmem:[#allocation34_spill] sm:$0xff] %v2546_v1 }
 0x128   :  { %v592_v42 = vsel %vm584_vm0, %v581_v28, -inf  ;;  %v606_v29 = vsel %vm584_vm0, %v583_v58, -inf  ;;  %v585_v31 = vsel %vm584_vm0, %v580_v4, -inf  ;;  %v599_v3 = vsel %vm584_vm0, %v582_v2, -inf }
 0x129   :  { %v593_v16 = vrot.slane %v592_v42, 4  ;;  %v607_v19 = vrot.slane %v606_v29, 4  ;;  %v586_v37 = vrot.slane %v585_v31, 4  ;;  %v600_v38 = vrot.slane %v599_v3, 4 }
 0x12b   :  { %v594_v63 = vmax.f32 %v592_v42, %v593_v16  ;;  %v608_v22 = vmax.f32 %v606_v29, %v607_v19  ;;  %v587_v40 = vmax.f32 %v585_v31, %v586_v37  ;;  %v601_v49 = vmax.f32 %v599_v3, %v600_v38 }
 0x12d   :  { %v595_v50 = vrot.slane %v594_v63, 2  ;;  %v609_v11 = vrot.slane %v608_v22, 2  ;;  %v588_v30 = vrot.slane %v587_v40, 2  ;;  %v602_v61 = vrot.slane %v601_v49, 2 }
 0x12f   :  { %v596_v27 = vmax.f32 %v594_v63, %v595_v50  ;;  %v610_v47 = vmax.f32 %v608_v22, %v609_v11  ;;  %v589_v23 = vmax.f32 %v587_v40, %v588_v30  ;;  %v603_v36 = vmax.f32 %v601_v49, %v602_v61 }
 0x131   :  { %v597_v26 = vrot.slane %v596_v27, 1  ;;  %v611_v51 = vrot.slane %v610_v47, 1  ;;  %v590_v18 = vrot.slane %v589_v23, 1  ;;  %v604_v41 = vrot.slane %v603_v36, 1 }
 0x133   :  { %v598_v39 = vmax.f32 %v596_v27, %v597_v26  ;;  %v612_v5 = vmax.f32 %v610_v47, %v611_v51  ;;  %v591_v0 = vmax.f32 %v589_v23, %v590_v18  ;;  %v605_v6 = vmax.f32 %v603_v36, %v604_v41 }
 0x135   :  { %vm617_vm1 = vcmp.ge.f32.partialorder %v581_v28, %v598_v39  ;;  %vm619_vm2 = vcmp.ge.f32.partialorder %v583_v58, %v612_v5  ;;  %vm616_vm3 = vcmp.ge.f32.partialorder %v580_v4, %v591_v0  ;;  %vm618_vm4 = vcmp.ge.f32.partialorder %v582_v2, %v605_v6 }
 0x136   :  { %v621_v59 = vsel %vm617_vm1, %v2546_v1, 7.0  ;;  %v623_v53 = vsel %vm619_vm2, %v2546_v1, 7.0  ;;  %v620_v17 = vsel %vm616_vm3, %v2546_v1, 7.0  ;;  %v622_v7 = vsel %vm618_vm4, %v2546_v1, 7.0 }
 0x137   :  { %v631_v42 = vsel %vm584_vm0, %v621_v59, inf  ;;  %v645_v29 = vsel %vm584_vm0, %v623_v53, inf  ;;  %v624_v31 = vsel %vm584_vm0, %v620_v17, inf  ;;  %v638_v3 = vsel %vm584_vm0, %v622_v7, inf }
 0x138   :  { %v632_v28 = vrot.slane %v631_v42, 4  ;;  %v646_v58 = vrot.slane %v645_v29, 4  ;;  %v625_v4 = vrot.slane %v624_v31, 4  ;;  %v639_v2 = vrot.slane %v638_v3, 4 }
 0x139   :  { %v3212_v39 = vmov 0.0  }
 0x13a   :  { %v633_v16 = vmin.f32 %v631_v42, %v632_v28  ;;  %v647_v19 = vmin.f32 %v645_v29, %v646_v58  ;;  %v626_v37 = vmin.f32 %v624_v31, %v625_v4  ;;  %v640_v38 = vmin.f32 %v638_v3, %v639_v2 }
 0x13c   :  { %v634_v63 = vrot.slane %v633_v16, 2  ;;  %v648_v22 = vrot.slane %v647_v19, 2  ;;  %v627_v40 = vrot.slane %v626_v37, 2  ;;  %v641_v49 = vrot.slane %v640_v38, 2 }
 0x13e   :  { %v635_v50 = vmin.f32 %v633_v16, %v634_v63  ;;  %v649_v11 = vmin.f32 %v647_v19, %v648_v22  ;;  %v628_v30 = vmin.f32 %v626_v37, %v627_v40  ;;  %v642_v61 = vmin.f32 %v640_v38, %v641_v49 }
 0x140   :  { %v629_v27 = vrot.slane %v628_v30, 1  ;;  %v643_v47 = vrot.slane %v642_v61, 1  ;;  %v636_v23 = vrot.slane %v635_v50, 1  ;;  %v650_v36 = vrot.slane %v649_v11, 1 }
 0x142   :  { %v630_v26 = vmin.f32 %v628_v30, %v629_v27  ;;  %v637_v51 = vmin.f32 %v635_v50, %v636_v23  ;;  %v644_v18 = vmin.f32 %v642_v61, %v643_v47  ;;  %v651_v41 = vmin.f32 %v649_v11, %v650_v36  ;;  %v110_v23 = vpop.f32.mrf.mxu0  ;;  %v180_v36 = vpop.f32.mrf.mxu1 }
 0x144   :  { %vm652_vm5 = vcmp.eq.f32.partialorder %v2546_v1, %v630_v26  ;;  %vm653_vm6 = vcmp.eq.f32.partialorder %v2546_v1, %v637_v51  ;;  %vm654_vm7 = vcmp.eq.f32.partialorder %v2546_v1, %v644_v18  ;;  %vm655_vm8 = vcmp.eq.f32.partialorder %v2546_v1, %v651_v41 }
 0x145   :  { %v2074_v5 = vsel %vm652_vm5, 1.0, %v3212_v39  ;;  %v2075_v0 = vsel %vm653_vm6, 1.0, %v3212_v39  ;;  %v2076_v6 = vsel %vm654_vm7, 1.0, %v3212_v39  ;;  %v2077_v59 = vsel %vm655_vm8, 1.0, %v3212_v39 }
 0x146   :  { %v668_v53 = vrot.slane %v2074_v5, 1  ;;  %v669_v17 = vrot.slane %v2075_v0, 1  ;;  %v680_v7 = vrot.slane %v2074_v5, 3  ;;  %v681_v42 = vrot.slane %v2075_v0, 3 }
 0x147   :  { %v704_v29 = vrot.slane %v2074_v5, 2  ;;  %v705_v31 = vrot.slane %v2075_v0, 2  ;;  %v670_v58 = vrot.slane %v2076_v6, 1  ;;  %v671_v4 = vrot.slane %v2077_v59, 1 }
 0x148   :  { %v676_v3 = vmax.f32 %v2074_v5, %v668_v53  ;;  %v677_v28 = vmax.f32 %v2075_v0, %v669_v17  ;;  %v692_v2 = vrot.slane %v2074_v5, 4  ;;  %v693_v16 = vrot.slane %v2075_v0, 4 }
 0x149   :  { %v682_v19 = vrot.slane %v2076_v6, 3  ;;  %v678_v40 = vmax.f32 %v2076_v6, %v670_v58  ;;  %v679_v49 = vmax.f32 %v2077_v59, %v671_v4  ;;  %v683_v50 = vrot.slane %v2077_v59, 3 }
 0x14a   :  { %v2564_v37 = vmax.f32 %v676_v3, %v680_v7  ;;  %v2566_v38 = vmax.f32 %v677_v28, %v681_v42  ;;  %v2568_v63 = vmax.f32 %v676_v3, %v704_v29  ;;  %v2570_v22 = vmax.f32 %v677_v28, %v705_v31  ;;  %v112_v7 = vpop.f32.mrf.mxu0  ;;  %v182_v42 = vpop.f32.mrf.mxu1 }
 0x14b   :  { %v694_v11 = vrot.slane %v2076_v6, 4  ;;  %v695_v27 = vrot.slane %v2077_v59, 4  ;;  %v706_v47 = vrot.slane %v2076_v6, 2  ;;  %v707_v41 = vrot.slane %v2077_v59, 2 }
 0x14c   :  { %v2573_v30 = vmax.f32 %v2564_v37, %v692_v2  ;;  %v701_v61 = vmax.f32 %v2566_v38, %v693_v16  ;;  %v720_v26 = vrot.slane %v2564_v37, 3  ;;  %v721_v51 = vrot.slane %v2566_v38, 3 }
 0x14d   :  { %v744_v18 = vrot.slane %v2568_v63, 7  ;;  %v745_v53 = vrot.slane %v2570_v22, 7  ;;  %v1075_v6 = vrot.slane %v2566_v38, %v2224_v15  ;;  %v690_v29 = vmax.f32 %v678_v40, %v682_v19 }
 0x14e   :  { %v732_v5 = vrot.slane %v2573_v30, 7  ;;  %v733_v0 = vrot.slane %v701_v61, 7  ;;  %v1095_v17 = vrot.slane %v701_v61, %v2208_v9  ;;  %v691_v31 = vmax.f32 %v679_v49, %v683_v50 }
 0x14f   :  { %v714_v3 = vmax.f32 %v678_v40, %v706_v47  ;;  %v1091_v59 = vrot.slane %v2573_v30, %v2208_v9  ;;  %v715_v4 = vmax.f32 %v679_v49, %v707_v41  ;;  %v1119_v61 = vrot.slane %v2570_v22, %v2211_v10 }
 0x150   :  { %v753_v28 = vsel %vm752_vm9, %v720_v26, %v732_v5  ;;  %v754_v58 = vsel %vm752_vm9, %v721_v51, %v733_v0  ;;  %v702_v7 = vmax.f32 %v690_v29, %v694_v11  ;;  %v1105_v19 = vmul.f32 %v1095_v17, %v2327_v45 }
 0x151   :  { %v758_v2 = vsel %vm757_vm10, %v753_v28, %v744_v18  ;;  %v759_v16 = vsel %vm757_vm10, %v754_v58, %v745_v53  ;;  %v703_v40 = vmax.f32 %v691_v31, %v695_v27  ;;  %v722_v50 = vrot.slane %v690_v29, 3 }
 0x152   :  { %v848_v38 = vcombine.low %v758_v2, %v759_v16  ;;  %920 = vmatprep.mubr.f32.mxu0 %v759_v16  ;;  %v723_v47 = vrot.slane %v691_v31, 3  ;;  %v734_v26 = vrot.slane %v702_v7, 7  ;;  %v746_v51 = vrot.slane %v714_v3, 7 }
 0x153   :  { %v747_v5 = vrot.slane %v715_v4, 7  ;;  %921 = vmatmul.mubr.f32.vlgmr.msra.gmra.mxu0 %v758_v2  ;;  %v735_v49 = vrot.slane %v703_v40, 7  ;;  %v1083_v30 = vrot.slane %v691_v31, %v2224_v15  ;;  %v1099_v22 = vrot.slane %v702_v7, %v2208_v9 }
 0x154   :  { %852 = vst [vmem:[%s3145_s2] sm:$0x77] %v848_v38  ;;  %v1103_v11 = vrot.slane %v703_v40, %v2208_v9  ;;  %1494 = vmatpush1.xpose.msra.mxu0 %v2278_v33  ;;  %v755_v27 = vsel %vm752_vm9, %v722_v50, %v734_v26  ;;  %v1127_v18 = vrot.slane %v715_v4, %v2211_v10 }
 0x155   :  { %v2602_v41 = vadd.f32 %v180_v36, %v110_v23  ;;  %v1071_v0 = vrot.slane %v2564_v37, %v2224_v15  ;;  %v756_v53 = vsel %vm752_vm9, %v723_v47, %v735_v49  ;;  %v760_v17 = vsel %vm757_vm10, %v755_v27, %v746_v51 }
 0x156   :  { %v1107_v42 = vmul.f32 %v1103_v11, %v2327_v45  ;;  %v1079_v31 = vrot.slane %v690_v29, %v2224_v15  ;;  %v1115_v33 = vrot.slane %v2568_v63, %v2211_v10  ;;  %v761_v28 = vsel %vm757_vm10, %v756_v53, %v747_v5  ;;  %v2647_v53 = vpop.permute.xlu0 %206 }
 0x157   :  { %3277 = vst [vmem:[#allocation35_spill] sm:$0xff] %v2602_v41  ;;  %v1123_v58 = vrot.slane %v714_v3, %v2211_v10  ;;  %v849_v23 = vcombine.low %v760_v17, %v761_v28  ;;  %990 = vmatprep.mubr.f32.mxu1 %v761_v28  ;;  %v1085_v36 = vmul.f32 %v1075_v6, %v2329_v46  ;;  %v3302_v41 = vld [vmem:[#allocation16_spill] sm:$0xff] }
 0x158   :  { %v1087_v37 = vmul.f32 %v1083_v30, %v2329_v46  ;;  %991 = vmatmul.mubr.f32.vlgmr.msra.gmra.mxu1 %v760_v17  ;;  %v1084_v4 = vmul.f32 %v1071_v0, %v2329_v46  ;;  %v1086_v2 = vmul.f32 %v1079_v31, %v2329_v46  ;;  %v1104_v29 = vmul.f32 %v1091_v59, %v2327_v45 }
 0x159   :  { %v1106_v16 = vmul.f32 %v1099_v22, %v2327_v45  ;;  %v1129_v63 = vmul.f32 %v1119_v61, %v2515_v48  ;;  %853 = vst [vmem:[%s3145_s2 + $0x8] sm:$0x77] %v849_v23  ;;  %v1131_v3 = vmul.f32 %v1127_v18, %v2515_v48  ;;  %v1109_v6 = vadd.f32 %v1105_v19, %v1085_v36  ;;  %v2636_v19 = vpop.permute.xlu1 %192 }
 0x15a   :  { %v1111_v7 = vadd.f32 %v1107_v42, %v1087_v37  ;;  %1564 = vmatpush1.xpose.msra.mxu1 %v2283_v34  ;;  %v1108_v38 = vadd.f32 %v1104_v29, %v1084_v4  ;;  %v1128_v50 = vmul.f32 %v1115_v33, %v2515_v48  ;;  %v1130_v59 = vmul.f32 %v1123_v58, %v2515_v48 }
 0x15b   :  { %v1110_v40 = vadd.f32 %v1106_v16, %v1086_v2  ;;  %v2628_v47 = vadd.f32 %v1129_v63, %v1109_v6 }
 0x15c   :  { %v2630_v26 = vadd.f32 %v1131_v3, %v1111_v7  ;;  %v2632_v61 = vadd.f32 %v1128_v50, %v1108_v38  ;;  %v3211_v3 = vrot.slane %v2546_v1, 6 }
 0x15d   :  { %v2634_v51 = vadd.f32 %v1130_v59, %v1110_v40  ;;  %v2649_v17 = vpop.permute.xlu1 %222 }
 0x161   :  { %v2657_v23 = vpop.permute.xlu1 %240 }
 0x213   :  { %v922_v5 = vpop.f32.mrf.mxu0 }
 0x215   :  { %v924_v49 = vpop.f32.mrf.mxu0 }
 0x218   :  { %v992_v30 = vpop.f32.mrf.mxu1 }
 0x219   :  { %v993_v34 = vadd.f32 %v992_v30, %v922_v5 }
 0x21a   :  { %v994_v22 = vpop.f32.mrf.mxu1 }
 0x21b   :  { %v996_v11 = vmul.f32 0.015625, %v993_v34 }
 0x21d   :  { %v2639_v27 = vrot.slane %v996_v11, %v2208_v9  ;;  %v2642_v18 = vrot.slane %v996_v11, %v2211_v10  ;;  %v2645_v0 = vrot.slane %v996_v11, %v2219_v13 }
 0x21f   :  { %3278 = vst [vmem:[#allocation36_spill] sm:$0xff] %v2639_v27  ;;  %3279 = vst [vmem:[#allocation37_spill] sm:$0xff] %v2642_v18  ;;  %v1002_v42 = vmul.f32 %v2639_v27, %v2636_v19  ;;  %v1008_v31 = vmul.f32 %v2642_v18, %v2647_v53  ;;  %v1016_v33 = vmul.f32 %v2645_v0, %v2649_v17 }
 0x220   :  { %3280 = vst [vmem:[#allocation38_spill] sm:$0xff] %v2645_v0 }
 0x221   :  { %v1010_v28 = vadd.f32 %v1008_v31, %v1002_v42 }
 0x223   :  { %v1018_v58 = vadd.f32 %v1016_v33, %v1010_v28 }
 0x225   :  { %v2660_v36 = vadd.f32 %v1018_v58, %v2657_v23 }
 0x227   :  { %3281 = vst [vmem:[#allocation39_spill] sm:$0xff] %v2660_v36  ;;  %v1022_v37 = vsel %vm1021_vm11, %v2660_v36, -inf }
 0x228   :  { %v1023_v4 = vrot.slane %v1022_v37, 4 }
 0x22a   :  { %v1024_v2 = vmax.f32 %v1022_v37, %v1023_v4 }
 0x22c   :  { %v1025_v29 = vrot.slane %v1024_v2, 2 }
 0x22e   :  { %v1026_v16 = vmax.f32 %v1024_v2, %v1025_v29 }
 0x230   :  { %v1027_v63 = vrot.slane %v1026_v16, 1 }
 0x232   :  { %v1028_v6 = vmax.f32 %v1026_v16, %v1027_v63  ;;  %v3286_v63 = vmov 2  }
 0x234   :  { %vm1029_vm12 = vcmp.ge.f32.partialorder %v2660_v36, %v1028_v6  ;;  %v3287_v6 = vmov 3  }
 0x235   :  { %v1033_v7 = vsel %vm1029_vm12, %v3211_v3, 4.0  ;;  %vm814_vm12 = vcmask 58368  }
 0x236   :  { %v1034_v38 = vsel %vm1021_vm11, %v1033_v7, inf  ;;  %v3288_v7 = vmov 4  }
 0x237   :  { %v1035_v40 = vrot.slane %v1034_v38, 4 }
 0x239   :  { %v1036_v50 = vmin.f32 %v1034_v38, %v1035_v40  ;;  %v3289_v38 = vmov 6   ;;  %v2699_v40 = vld [vmem:[%s3143_s1 + $0x18] sm:$0xff] }
 0x23a   :  { %3290 = vst [vmem:[#allocation44_spill] sm:$0xff] %v2699_v40 }
 0x23b   :  { %v1037_v59 = vrot.slane %v1036_v50, 2 }
 0x23d   :  { %v1038_v5 = vmin.f32 %v1036_v50, %v1037_v59  ;;  %v3291_v50 = vmov 5   ;;  %v3292_v59 = vmov 0  }
 0x23f   :  { %v1039_v49 = vrot.slane %v1038_v5, 1 }
 0x241   :  { %v1040_v30 = vmin.f32 %v1038_v5, %v1039_v49  ;;  %v2707_v5 = vld [vmem:[%s3143_s1 + $0x20] sm:$0x3]  ;;  %v3294_v49 = vmov 7  }
 0x242   :  { %3293 = vst [vmem:[#allocation45_spill] sm:$0xff] %v2707_v5 }
 0x243   :  { %vm1041_vm13 = vcmp.eq.f32.partialorder %v2546_v1, %v1040_v30  ;;  %v3295_v30 = vmov 1  }
 0x244   :  { %v2080_v34 = vsel %vm1041_vm13, 1.0, %v3212_v39 }
 0x245   :  { %v2672_v22 = vrot.slane %v2080_v34, %v2208_v9  ;;  %v2675_v11 = vrot.slane %v2080_v34, %v2211_v10  ;;  %v2678_v42 = vrot.slane %v2080_v34, %v2219_v13  ;;  %v2685_v28 = vrot.slane %v2080_v34, %v2224_v15  ;;  %v26_v34 = vld [vmem:[%s3143_s1 + $0x28] sm:$0xff] }
 0x247   :  { %3282 = vst [vmem:[#allocation40_spill] sm:$0xff] %v2672_v22  ;;  %3283 = vst [vmem:[#allocation41_spill] sm:$0xff] %v2675_v11  ;;  %v1048_v31 = vmul.f32 %v2672_v22, %v2216_v12  ;;  %v1053_v33 = vmul.f32 %v2675_v11, %v2238_v20  ;;  %v1059_v37 = vmul.f32 %v2678_v42, %v2221_v14 }
 0x248   :  { %3284 = vst [vmem:[#allocation42_spill] sm:$0xff] %v2678_v42  ;;  %3285 = vst [vmem:[#allocation43_spill] sm:$0xff] %v2685_v28  ;;  %v1065_v2 = vmul.f32 %v2685_v28, %v2240_v21  ;;  %v3300_v28 = vld [vmem:[#allocation14_spill] sm:$0xff] }
 0x249   :  { %v1054_v58 = vadd.f32 %v1053_v33, %v1048_v31 }
 0x24b   :  { %v1060_v4 = vadd.f32 %v1059_v37, %v1054_v58 }
 0x24d   :  { %v1066_v29 = vadd.f32 %v1065_v2, %v1060_v4  ;;  %v3296_v2 = vld [vmem:[#allocation10_spill] sm:$0xff] }
 0x24f   :  { %v1067_v16 = vadd.f32 %v1066_v29, %v2273_v32 }
 0x251   :  { %1146 = vperm.xlu1 %2130, %v1067_v16   ;;  %1138 = vperm.xlu0 %2129, %v1067_v16  }
 0x255   :  { %2131 = vset.pattern.permute.xlu1 %v3286_v63  ;;  %2132 = vset.pattern.permute.xlu0 %v3287_v6 }
 0x256   :  { %1158 = vperm.xlu1 %2131, %v1067_v16   ;;  %1170 = vperm.xlu0 %2132, %v1067_v16  }
 0x25a   :  { %2133 = vset.pattern.permute.xlu1 %v3288_v7  ;;  %2135 = vset.pattern.permute.xlu0 %v3289_v38  ;;  %v3305_v38 = vld [vmem:[#allocation19_spill] sm:$0xff] }
 0x25b   :  { %1182 = vperm.xlu1 %2133, %v1067_v16   ;;  %1206 = vperm.xlu0 %2135, %v1067_v16  }
 0x25f   :  { %2134 = vset.pattern.permute.xlu1 %v3291_v50  ;;  %2139 = vset.pattern.permute.xlu0 %v3292_v59 }
 0x260   :  { %1194 = vperm.xlu1 %2134, %v1067_v16   ;;  %764 = vperm.xlu0 %2139, %v2699_v40  }
 0x264   :  { %2136 = vset.pattern.permute.xlu1 %v3294_v49  ;;  %2142 = vset.pattern.permute.xlu0 %v3295_v30 }
 0x265   :  { %1218 = vperm.xlu1 %2136, %v1067_v16   ;;  %779 = vperm.xlu0 %2142, %v2707_v5   ;;  %v3297_v16 = vld [vmem:[#allocation11_spill] sm:$0xff] }
 0x269   :  { %2137 = vset.pattern.permute.xlu1 %v3292_v59 }
 0x26a   :  { %187 = vperm.xlu1 %2137, %v26_v34  }
 0x26e   :  { %2138 = vset.pattern.permute.xlu1 %v3295_v30 }
 0x26f   :  { %202 = vperm.xlu1 %2138, %v26_v34  }
 0x273   :  { %2140 = vset.pattern.permute.xlu1 %v3292_v59 }
 0x274   :  { %769 = vperm.xlu1 %2140, %v2707_v5   ;;  %v3307_v5 = vld [vmem:[#allocation21_spill] sm:$0xff] }
 0x278   :  { %2141 = vset.pattern.permute.xlu1 %v3295_v30  ;;  %v3298_v30 = vld [vmem:[#allocation12_spill] sm:$0xff] }
 0x279   :  { %775 = vperm.xlu1 %2141, %v2699_v40   ;;  %v3303_v40 = vld [vmem:[#allocation17_spill] sm:$0xff] }
 0x27d   :  { %2143 = vset.pattern.permute.xlu1 %v3286_v63 }
 0x27e   :  { %218 = vperm.xlu1 %2143, %v26_v34  }
 0x282   :  { %2144 = vset.pattern.permute.xlu1 %v3292_v59  ;;  %v3306_v59 = vld [vmem:[#allocation20_spill] sm:$0xff] }
 0x2cc   :  { %v1147_v31 = vpop.permute.xlu1 %1146  ;;  %v1139_v33 = vpop.permute.xlu0 %1138 }
 0x2cd   :  { %v1149_v58 = vmul.f32 %v1147_v31, %v2349_v55  ;;  %v1150_v37 = vmul.f32 %v1147_v31, %v2353_v56  ;;  %v1151_v4 = vmul.f32 %v1147_v31, %v2357_v57  ;;  %v1152_v29 = vmul.f32 %v1147_v31, %v3296_v2  ;;  %v3301_v55 = vld [vmem:[#allocation15_spill] sm:$0xff]  ;;  %v3304_v2 = vld [vmem:[#allocation18_spill] sm:$0xff] }
 0x2ce   :  { %v1141_v3 = vmul.f32 %v1139_v33, %v3297_v16  ;;  %v1142_v39 = vmul.f32 %v1139_v33, %v3298_v30  ;;  %v1143_v36 = vmul.f32 %v1139_v33, %v3299_v8  ;;  %v1144_v34 = vmul.f32 %v1139_v33, %v3300_v28 }
 0x2d0   :  { %v1153_v42 = vadd.f32 %v1149_v58, %v1141_v3  ;;  %v1154_v0 = vadd.f32 %v1150_v37, %v1142_v39  ;;  %v1155_v18 = vadd.f32 %v1151_v4, %v1143_v36  ;;  %v1156_v27 = vadd.f32 %v1152_v29, %v1144_v34  ;;  %v3308_v3 = vld [vmem:[#allocation22_spill] sm:$0xff] }
 0x2d1   :  { %v1159_v11 = vpop.permute.xlu1 %1158  ;;  %v1171_v22 = vpop.permute.xlu0 %1170 }
 0x2d2   :  { %v1161_v56 = vmul.f32 %v1159_v11, %v3301_v55  ;;  %v1162_v57 = vmul.f32 %v1159_v11, %v3302_v41  ;;  %v1163_v31 = vmul.f32 %v1159_v11, %v3303_v40  ;;  %v1164_v16 = vmul.f32 %v1159_v11, %v3304_v2  ;;  %v3309_v40 = vld [vmem:[#allocation23_spill] sm:$0xff]  ;;  %v3310_v11 = vld [vmem:[#allocation24_spill] sm:$0xff] }
 0x2d3   :  { %v1173_v30 = vmul.f32 %v1171_v22, %v3305_v38  ;;  %v1174_v8 = vmul.f32 %v1171_v22, %v3306_v59  ;;  %v1175_v33 = vmul.f32 %v1171_v22, %v3307_v5  ;;  %v1176_v39 = vmul.f32 %v1171_v22, %v3308_v3  ;;  %v3311_v38 = vld [vmem:[#allocation25_spill] sm:$0xff]  ;;  %v3312_v59 = vld [vmem:[#allocation26_spill] sm:$0xff] }
 0x2d4   :  { %v1165_v36 = vadd.f32 %v1161_v56, %v1153_v42  ;;  %v1166_v58 = vadd.f32 %v1162_v57, %v1154_v0  ;;  %v1167_v37 = vadd.f32 %v1163_v31, %v1155_v18  ;;  %v1168_v4 = vadd.f32 %v1164_v16, %v1156_v27  ;;  %v3313_v27 = vld [vmem:[#allocation27_spill] sm:$0xff]  ;;  %v3315_v16 = vld [vmem:[#allocation29_spill] sm:$0xff] }
 0x2d6   :  { %v1177_v29 = vadd.f32 %v1173_v30, %v1165_v36  ;;  %v1178_v34 = vadd.f32 %v1174_v8, %v1166_v58  ;;  %v1179_v55 = vadd.f32 %v1175_v33, %v1167_v37  ;;  %v1180_v41 = vadd.f32 %v1176_v39, %v1168_v4  ;;  %v1183_v28 = vpop.permute.xlu1 %1182  ;;  %v1207_v5 = vpop.permute.xlu0 %1206  ;;  %v3314_v8 = vld [vmem:[#allocation28_spill] sm:$0xff] }
 0x2d7   :  { %v1185_v50 = vmul.f32 %v1183_v28, %v3309_v40  ;;  %v1186_v2 = vmul.f32 %v1183_v28, %v3310_v11  ;;  %v1187_v6 = vmul.f32 %v1183_v28, %v3311_v38  ;;  %v1188_v49 = vmul.f32 %v1183_v28, %v3312_v59 }
 0x2d8   :  { %v1209_v33 = vmul.f32 %v1207_v5, %v2492_v35  ;;  %v1210_v39 = vmul.f32 %v1207_v5, %v2495_v52  ;;  %v1211_v28 = vmul.f32 %v1207_v5, %v2498_v54 }
 0x2d9   :  { %v1189_v63 = vadd.f32 %v1185_v50, %v1177_v29  ;;  %v1190_v22 = vadd.f32 %v1186_v2, %v1178_v34  ;;  %v1191_v56 = vadd.f32 %v1187_v6, %v1179_v55  ;;  %v1192_v57 = vadd.f32 %v1188_v49, %v1180_v41 }
 0x2da   :  { %v1212_v50 = vmul.f32 %v1207_v5, %v2501_v60 }
 0x2db   :  { %v1195_v18 = vpop.permute.xlu1 %1194 }
 0x2dc   :  { %v1197_v0 = vmul.f32 %v1195_v18, %v3313_v27  ;;  %v1198_v42 = vmul.f32 %v1195_v18, %v3314_v8  ;;  %v1199_v30 = vmul.f32 %v1195_v18, %v3315_v16  ;;  %v1200_v31 = vmul.f32 %v1195_v18, %v2484_v25 }
 0x2de   :  { %v1201_v2 = vadd.f32 %v1197_v0, %v1189_v63  ;;  %v1202_v55 = vadd.f32 %v1198_v42, %v1190_v22  ;;  %v1203_v41 = vadd.f32 %v1199_v30, %v1191_v56  ;;  %v1204_v6 = vadd.f32 %v1200_v31, %v1192_v57 }
 0x2e0   :  { %v1219_v49 = vpop.permute.xlu1 %1218  ;;  %v1213_v36 = vadd.f32 %v1209_v33, %v1201_v2  ;;  %v1214_v58 = vadd.f32 %v1210_v39, %v1202_v55  ;;  %v1215_v37 = vadd.f32 %v1211_v28, %v1203_v41  ;;  %v1216_v4 = vadd.f32 %v1212_v50, %v1204_v6 }
 0x2e1   :  { %v1221_v29 = vmul.f32 %v1219_v49, %v2504_v43  ;;  %v1222_v34 = vmul.f32 %v1219_v49, %v2507_v44  ;;  %v1223_v18 = vmul.f32 %v1219_v49, %v2510_v62  ;;  %v1224_v52 = vmul.f32 %v1219_v49, %v2513_v24 }
 0x2e3   :  { %v1225_v54 = vadd.f32 %v1221_v29, %v1213_v36  ;;  %v1226_v35 = vadd.f32 %v1222_v34, %v1214_v58  ;;  %v1227_v5 = vadd.f32 %v1223_v18, %v1215_v37  ;;  %v1228_v63 = vadd.f32 %v1224_v52, %v1216_v4 }
 0x2e5   :  { %v1229_v22 = vadd.f32 %v1225_v54, %v2632_v61  ;;  %v1230_v56 = vadd.f32 %v1226_v35, %v2628_v47  ;;  %v1231_v57 = vadd.f32 %v1227_v5, %v2634_v51  ;;  %v1232_v0 = vadd.f32 %v1228_v63, %v2630_v26 }
 0x2e7   :  { %v1233_v42 = vsel %vm584_vm0, %v1229_v22, -inf  ;;  %v1240_v30 = vsel %vm584_vm0, %v1230_v56, -inf  ;;  %v1247_v31 = vsel %vm584_vm0, %v1231_v57, -inf  ;;  %v1254_v33 = vsel %vm584_vm0, %v1232_v0, -inf }
 0x2e8   :  { %v1234_v39 = vrot.slane %v1233_v42, 4  ;;  %v1241_v28 = vrot.slane %v1240_v30, 4  ;;  %v1248_v50 = vrot.slane %v1247_v31, 4  ;;  %v1255_v52 = vrot.slane %v1254_v33, 4 }
 0x2ea   :  { %v1235_v2 = vmax.f32 %v1233_v42, %v1234_v39  ;;  %v1242_v54 = vmax.f32 %v1240_v30, %v1241_v28  ;;  %v1249_v61 = vmax.f32 %v1247_v31, %v1248_v50  ;;  %v1256_v35 = vmax.f32 %v1254_v33, %v1255_v52 }
 0x2ec   :  { %v1236_v47 = vrot.slane %v1235_v2, 2  ;;  %v1243_v51 = vrot.slane %v1242_v54, 2  ;;  %v1250_v55 = vrot.slane %v1249_v61, 2  ;;  %v1257_v26 = vrot.slane %v1256_v35, 2 }
 0x2ee   :  { %v1237_v41 = vmax.f32 %v1235_v2, %v1236_v47  ;;  %v1244_v6 = vmax.f32 %v1242_v54, %v1243_v51  ;;  %v1251_v49 = vmax.f32 %v1249_v61, %v1250_v55  ;;  %v1258_v36 = vmax.f32 %v1256_v35, %v1257_v26 }
 0x2f0   :  { %v1238_v58 = vrot.slane %v1237_v41, 1  ;;  %v1245_v37 = vrot.slane %v1244_v6, 1  ;;  %v1252_v4 = vrot.slane %v1251_v49, 1  ;;  %v1259_v29 = vrot.slane %v1258_v36, 1 }
 0x2f2   :  { %v1239_v34 = vmax.f32 %v1237_v41, %v1238_v58  ;;  %v1246_v18 = vmax.f32 %v1244_v6, %v1245_v37  ;;  %v1253_v5 = vmax.f32 %v1251_v49, %v1252_v4  ;;  %v1260_v63 = vmax.f32 %v1258_v36, %v1259_v29 }
 0x2f4   :  { %vm1261_vm14 = vcmp.ge.f32.partialorder %v1229_v22, %v1239_v34  ;;  %vm1262_vm15 = vcmp.ge.f32.partialorder %v1230_v56, %v1246_v18  ;;  %vm1263_vm1 = vcmp.ge.f32.partialorder %v1231_v57, %v1253_v5  ;;  %vm1264_vm2 = vcmp.ge.f32.partialorder %v1232_v0, %v1260_v63 }
 0x2f5   :  { %v1265_v42 = vsel %vm1261_vm14, %v2546_v1, 7.0  ;;  %v1266_v30 = vsel %vm1262_vm15, %v2546_v1, 7.0  ;;  %v1267_v31 = vsel %vm1263_vm1, %v2546_v1, 7.0  ;;  %v1268_v33 = vsel %vm1264_vm2, %v2546_v1, 7.0 }
 0x2f6   :  { %v1269_v39 = vsel %vm584_vm0, %v1265_v42, inf  ;;  %v1276_v28 = vsel %vm584_vm0, %v1266_v30, inf  ;;  %v1283_v50 = vsel %vm584_vm0, %v1267_v31, inf  ;;  %v1290_v52 = vsel %vm584_vm0, %v1268_v33, inf }
 0x2f7   :  { %v1270_v22 = vrot.slane %v1269_v39, 4  ;;  %v1277_v56 = vrot.slane %v1276_v28, 4  ;;  %v1284_v57 = vrot.slane %v1283_v50, 4  ;;  %v1291_v0 = vrot.slane %v1290_v52, 4 }
 0x2f8   :  { %v3316_v42 = vmov 0.0  }
 0x2f9   :  { %v1271_v2 = vmin.f32 %v1269_v39, %v1270_v22  ;;  %v1278_v54 = vmin.f32 %v1276_v28, %v1277_v56  ;;  %v1285_v61 = vmin.f32 %v1283_v50, %v1284_v57  ;;  %v1292_v35 = vmin.f32 %v1290_v52, %v1291_v0 }
 0x2fb   :  { %v1272_v47 = vrot.slane %v1271_v2, 2  ;;  %v1279_v51 = vrot.slane %v1278_v54, 2  ;;  %v1286_v55 = vrot.slane %v1285_v61, 2  ;;  %v1293_v26 = vrot.slane %v1292_v35, 2 }
 0x2fd   :  { %v1273_v41 = vmin.f32 %v1271_v2, %v1272_v47  ;;  %v1280_v6 = vmin.f32 %v1278_v54, %v1279_v51  ;;  %v1287_v49 = vmin.f32 %v1285_v61, %v1286_v55  ;;  %v1294_v36 = vmin.f32 %v1292_v35, %v1293_v26 }
 0x2ff   :  { %v1274_v58 = vrot.slane %v1273_v41, 1  ;;  %v1281_v37 = vrot.slane %v1280_v6, 1  ;;  %v1288_v4 = vrot.slane %v1287_v49, 1  ;;  %v1295_v29 = vrot.slane %v1294_v36, 1 }
 0x301   :  { %v1275_v34 = vmin.f32 %v1273_v41, %v1274_v58  ;;  %v1282_v18 = vmin.f32 %v1280_v6, %v1281_v37  ;;  %v1289_v5 = vmin.f32 %v1287_v49, %v1288_v4  ;;  %v1296_v63 = vmin.f32 %v1294_v36, %v1295_v29 }
 0x303   :  { %vm1297_vm3 = vcmp.eq.f32.partialorder %v2546_v1, %v1275_v34  ;;  %vm1298_vm4 = vcmp.eq.f32.partialorder %v2546_v1, %v1282_v18  ;;  %vm1299_vm5 = vcmp.eq.f32.partialorder %v2546_v1, %v1289_v5  ;;  %vm1300_vm6 = vcmp.eq.f32.partialorder %v2546_v1, %v1296_v63 }
 0x304   :  { %v2081_v30 = vsel %vm1297_vm3, 1.0, %v3316_v42  ;;  %v2082_v31 = vsel %vm1298_vm4, 1.0, %v3316_v42  ;;  %v2083_v33 = vsel %vm1299_vm5, 1.0, %v3316_v42  ;;  %v2084_v39 = vsel %vm1300_vm6, 1.0, %v3316_v42 }
 0x305   :  { %v1313_v28 = vrot.slane %v2081_v30, 1  ;;  %v1314_v50 = vrot.slane %v2082_v31, 1  ;;  %v1325_v52 = vrot.slane %v2081_v30, 3  ;;  %v1326_v22 = vrot.slane %v2082_v31, 3 }
 0x306   :  { %v1349_v56 = vrot.slane %v2081_v30, 2  ;;  %v1350_v57 = vrot.slane %v2082_v31, 2  ;;  %v1315_v54 = vrot.slane %v2083_v33, 1  ;;  %v1316_v61 = vrot.slane %v2084_v39, 1 }
 0x307   :  { %v1321_v0 = vmax.f32 %v2081_v30, %v1313_v28  ;;  %v1322_v2 = vmax.f32 %v2082_v31, %v1314_v50  ;;  %v1337_v35 = vrot.slane %v2081_v30, 4  ;;  %v1338_v47 = vrot.slane %v2082_v31, 4 }
 0x308   :  { %v1327_v51 = vrot.slane %v2083_v33, 3  ;;  %v1328_v55 = vrot.slane %v2084_v39, 3  ;;  %v1323_v36 = vmax.f32 %v2083_v33, %v1315_v54  ;;  %v1324_v58 = vmax.f32 %v2084_v39, %v1316_v61 }
 0x309   :  { %v1333_v26 = vmax.f32 %v1321_v0, %v1325_v52  ;;  %v1334_v41 = vmax.f32 %v1322_v2, %v1326_v22  ;;  %v1357_v6 = vmax.f32 %v1321_v0, %v1349_v56  ;;  %v2779_v49 = vmax.f32 %v1322_v2, %v1350_v57 }
 0x30a   :  { %v1339_v37 = vrot.slane %v2083_v33, 4  ;;  %v1340_v4 = vrot.slane %v2084_v39, 4  ;;  %v1351_v18 = vrot.slane %v2083_v33, 2  ;;  %v1352_v5 = vrot.slane %v2084_v39, 2 }
 0x30b   :  { %v1345_v29 = vmax.f32 %v1333_v26, %v1337_v35  ;;  %v1346_v34 = vmax.f32 %v1334_v41, %v1338_v47  ;;  %v1365_v63 = vrot.slane %v1333_v26, 3  ;;  %v1366_v28 = vrot.slane %v1334_v41, 3 }
 0x30c   :  { %v1389_v50 = vrot.slane %v1357_v6, 7  ;;  %v1390_v30 = vrot.slane %v2779_v49, 7  ;;  %v1674_v56 = vrot.slane %v1333_v26, %v2224_v15  ;;  %v1678_v57 = vrot.slane %v1334_v41, %v2224_v15 }
 0x30d   :  { %v1377_v31 = vrot.slane %v1345_v29, 7  ;;  %v1378_v24 = vrot.slane %v1346_v34, 7  ;;  %v1694_v52 = vrot.slane %v1345_v29, %v2208_v9  ;;  %v1698_v22 = vrot.slane %v1346_v34, %v2208_v9 }
 0x30e   :  { %v1335_v0 = vmax.f32 %v1323_v36, %v1327_v51  ;;  %v1336_v2 = vmax.f32 %v1324_v58, %v1328_v55  ;;  %v1718_v54 = vrot.slane %v1357_v6, %v2211_v10  ;;  %v1722_v61 = vrot.slane %v2779_v49, %v2211_v10 }
 0x30f   :  { %v1397_v33 = vsel %vm752_vm9, %v1365_v63, %v1377_v31  ;;  %v1398_v39 = vsel %vm752_vm9, %v1366_v28, %v1378_v24  ;;  %v1707_v29 = vmul.f32 %v1694_v52, %v2327_v45  ;;  %v1708_v26 = vmul.f32 %v1698_v22, %v2327_v45 }
 0x310   :  { %v1401_v35 = vsel %vm757_vm10, %v1397_v33, %v1389_v50  ;;  %v1402_v47 = vsel %vm757_vm10, %v1398_v39, %v1390_v30  ;;  %v1347_v51 = vmax.f32 %v1335_v0, %v1339_v37  ;;  %v1348_v55 = vmax.f32 %v1336_v2, %v1340_v4 }
 0x311   :  { %v1453_v41 = vcombine.low %v1401_v35, %v1402_v47  ;;  %1527 = vmatprep.mubr.f32.mxu0 %v1402_v47  ;;  %v1359_v34 = vmax.f32 %v1323_v36, %v1351_v18  ;;  %v1360_v63 = vmax.f32 %v1324_v58, %v1352_v5  ;;  %v1367_v24 = vrot.slane %v1335_v0, 3 }
 0x312   :  { %v1368_v28 = vrot.slane %v1336_v2, 3  ;;  %v1682_v6 = vrot.slane %v1335_v0, %v2224_v15  ;;  %1528 = vmatmul.mubr.f32.vlgmr.msra.gmra.mxu0 %v1401_v35  ;;  %v1379_v49 = vrot.slane %v1347_v51, 7  ;;  %v1380_v50 = vrot.slane %v1348_v55, 7 }
 0x313   :  { %2087 = vst [vmem:[%s3145_s2 + $0x10] sm:$0x77] %v1453_v41  ;;  %v1391_v30 = vrot.slane %v1359_v34, 7  ;;  %v1686_v31 = vrot.slane %v1336_v2, %v2224_v15  ;;  %v1392_v52 = vrot.slane %v1360_v63, 7  ;;  %v1702_v37 = vrot.slane %v1347_v51, %v2208_v9 }
 0x314   :  { %v1706_v36 = vrot.slane %v1348_v55, %v2208_v9  ;;  %v1726_v58 = vrot.slane %v1359_v34, %v2211_v10  ;;  %v1399_v4 = vsel %vm752_vm9, %v1367_v24, %v1379_v49  ;;  %v1400_v18 = vsel %vm752_vm9, %v1368_v28, %v1380_v50 }
 0x315   :  { %v1730_v5 = vrot.slane %v1360_v63, %v2211_v10  ;;  %v1687_v22 = vmul.f32 %v1674_v56, %v2329_v46  ;;  %v1403_v0 = vsel %vm757_vm10, %v1399_v4, %v1391_v30  ;;  %v1404_v33 = vsel %vm757_vm10, %v1400_v18, %v1392_v52 }
 0x316   :  { %v1709_v2 = vmul.f32 %v1702_v37, %v2327_v45  ;;  %v1710_v39 = vmul.f32 %v1706_v36, %v2327_v45  ;;  %v1454_v35 = vcombine.low %v1403_v0, %v1404_v33  ;;  %1597 = vmatprep.mubr.f32.mxu1 %v1404_v33  ;;  %v1688_v47 = vmul.f32 %v1678_v57, %v2329_v46 }
 0x317   :  { %v1731_v41 = vmul.f32 %v1718_v54, %v2515_v48  ;;  %1598 = vmatmul.mubr.f32.vlgmr.msra.gmra.mxu1 %v1403_v0  ;;  %v1689_v51 = vmul.f32 %v1682_v6, %v2329_v46  ;;  %v1690_v55 = vmul.f32 %v1686_v31, %v2329_v46  ;;  %v1711_v56 = vadd.f32 %v1707_v29, %v1687_v22 }
 0x318   :  { %v1732_v34 = vmul.f32 %v1722_v61, %v2515_v48  ;;  %2088 = vst [vmem:[%s3145_s2 + $0x18] sm:$0x77] %v1454_v35  ;;  %v1733_v45 = vmul.f32 %v1726_v58, %v2515_v48  ;;  %v1712_v63 = vadd.f32 %v1708_v26, %v1688_v47  ;;  %v1734_v24 = vmul.f32 %v1730_v5, %v2515_v48  ;;  %v2829_v61 = vpop.permute.xlu1 %187 }
 0x319   :  { %v1713_v57 = vadd.f32 %v1709_v2, %v1689_v51  ;;  %v1714_v28 = vadd.f32 %v1710_v39, %v1690_v55  ;;  %v2821_v54 = vadd.f32 %v1731_v41, %v1711_v56 }
 0x31a   :  { %v2823_v49 = vadd.f32 %v1732_v34, %v1712_v63 }
 0x31b   :  { %v2825_v6 = vadd.f32 %v1733_v45, %v1713_v57  ;;  %v2827_v46 = vadd.f32 %v1734_v24, %v1714_v28 }
 0x31c   :  { %v2831_v29 = vpop.permute.xlu1 %202 }
 0x320   :  { %v2833_v30 = vpop.permute.xlu1 %769 }
 0x324   :  { %v2835_v52 = vpop.permute.xlu1 %775 }
 0x328   :  { %v2844_v2 = vpop.permute.xlu1 %218 }
 0x3d2   :  { %v1529_v50 = vpop.f32.mrf.mxu0 }
 0x3d4   :  { %v1531_v26 = vpop.f32.mrf.mxu0 }
 0x3d5   :  { %v3318_v26 = vrot.slane %v2546_v1, 6 }
 0x3d7   :  { %v1599_v31 = vpop.f32.mrf.mxu1 }
 0x3d8   :  { %v1600_v48 = vadd.f32 %v1599_v31, %v1529_v50 }
 0x3d9   :  { %v1601_v37 = vpop.f32.mrf.mxu1 }
 0x3da   :  { %v1603_v36 = vmul.f32 0.015625, %v1600_v48 }
 0x3dc   :  { %v1607_v58 = vrot.slane %v1603_v36, %v2208_v9  ;;  %v1613_v4 = vrot.slane %v1603_v36, %v2211_v10  ;;  %v1621_v18 = vrot.slane %v1603_v36, %v2219_v13 }
 0x3de   :  { %v1608_v5 = vmul.f32 %v1607_v58, %v2829_v61  ;;  %v1609_v22 = vmul.f32 %v1607_v58, %v2636_v19  ;;  %v1614_v0 = vmul.f32 %v1613_v4, %v2831_v29  ;;  %v1615_v33 = vmul.f32 %v1613_v4, %v2647_v53 }
 0x3df   :  { %v1623_v35 = vmul.f32 %v1621_v18, %v2649_v17  ;;  %v1622_v47 = vmul.f32 %v1621_v18, %v2844_v2 }
 0x3e0   :  { %v1617_v39 = vadd.f32 %v1615_v33, %v1609_v22  ;;  %v1616_v41 = vadd.f32 %v1614_v0, %v1608_v5  ;;  %v2859_v5 = vpop.permute.xlu0 %764 }
 0x3e2   :  { %v1625_v51 = vadd.f32 %v1623_v35, %v1617_v39  ;;  %v2848_v55 = vadd.f32 %v1622_v47, %v1616_v41 }
 0x3e4   :  { %v2851_v56 = vadd.f32 %v1625_v51, %v2657_v23  ;;  %v2868_v47 = vpop.permute.xlu0 %779 }
 0x3e6   :  { %3317 = vst [vmem:[#allocation22_spill] sm:$0xff] %v2851_v56  ;;  %v1628_v34 = vsel %vm1021_vm11, %v2851_v56, -inf }
 0x3e7   :  { %v1629_v45 = vrot.slane %v1628_v34, 4 }
 0x3e9   :  { %v1630_v63 = vmax.f32 %v1628_v34, %v1629_v45 }
 0x3eb   :  { %v1631_v24 = vrot.slane %v1630_v63, 2 }
 0x3ed   :  { %v1632_v57 = vmax.f32 %v1630_v63, %v1631_v24 }
 0x3ef   :  { %v1633_v28 = vrot.slane %v1632_v57, 1 }
 0x3f1   :  { %v1634_v50 = vmax.f32 %v1632_v57, %v1633_v28 }
 0x3f3   :  { %vm1635_vm7 = vcmp.ge.f32.partialorder %v2851_v56, %v1634_v50 }
 0x3f4   :  { %v1636_v31 = vsel %vm1635_vm7, %v3318_v26, 4.0 }
 0x3f5   :  { %v1637_v48 = vsel %vm1021_vm11, %v1636_v31, inf  ;;  %vm812_vm11 = vcmask 64512  }
 0x3f6   :  { %v1638_v37 = vrot.slane %v1637_v48, 4 }
 0x3f8   :  { %v1639_v36 = vmin.f32 %v1637_v48, %v1638_v37  ;;  %v3320_v37 = vmov 2  }
 0x3fa   :  { %v1640_v58 = vrot.slane %v1639_v36, 2 }
 0x3fc   :  { %v1641_v4 = vmin.f32 %v1639_v36, %v1640_v58  ;;  %v3322_v36 = vmov 3   ;;  %v3324_v58 = vld [vmem:[#allocation45_spill] sm:$0xff] }
 0x3fe   :  { %v1642_v18 = vrot.slane %v1641_v4, 1 }
 0x400   :  { %v1643_v22 = vmin.f32 %v1641_v4, %v1642_v18  ;;  %v3326_v4 = vmov 6   ;;  %v3327_v18 = vld [vmem:[#allocation44_spill] sm:$0xff] }
 0x402   :  { %vm1644_vm8 = vcmp.eq.f32.partialorder %v2546_v1, %v1643_v22  ;;  %v3328_v22 = vld [vmem:[#allocation35_spill] sm:$0xff] }
 0x403   :  { %v2091_v0 = vsel %vm1644_vm8, 1.0, %v3316_v42 }
 0x404   :  { %v1650_v33 = vrot.slane %v2091_v0, %v2208_v9  ;;  %v1655_v39 = vrot.slane %v2091_v0, %v2211_v10  ;;  %v2866_v35 = vrot.slane %v2091_v0, %v2219_v13  ;;  %v2873_v34 = vrot.slane %v2091_v0, %v2224_v15 }
 0x405   :  { %v184_v0 = vmul.f32 0.015625, %v3328_v22  ;;  %v3338_v22 = vld [vmem:[#allocation16_spill] sm:$0xff] }
 0x406   :  { %v1651_v41 = vmul.f32 %v1650_v33, %v2216_v12  ;;  %v1656_v51 = vmul.f32 %v1655_v39, %v2238_v20  ;;  %v2009_v45 = vmul.f32 %v1650_v33, %v2833_v30  ;;  %v2011_v63 = vmul.f32 %v1655_v39, %v2868_v47 }
 0x407   :  { %v2008_v24 = vmul.f32 %v1650_v33, %v2859_v5  ;;  %v2010_v57 = vmul.f32 %v1655_v39, %v2835_v52  ;;  %v1662_v50 = vmul.f32 %v2866_v35, %v2221_v14  ;;  %v1668_v15 = vmul.f32 %v2873_v34, %v2240_v21 }
 0x408   :  { %v1657_v28 = vadd.f32 %v1656_v51, %v1651_v41  ;;  %v2881_v26 = vadd.f32 %v2011_v63, %v2009_v45  ;;  %v3321_v14 = vmov 7   ;;  %v3323_v21 = vmov 5  }
 0x409   :  { %v2883_v12 = vadd.f32 %v2010_v57, %v2008_v24  ;;  %v198_v33 = vrot.slane %v184_v0, %v2208_v9  ;;  %v212_v39 = vrot.slane %v184_v0, %v2211_v10  ;;  %v228_v45 = vrot.slane %v184_v0, %v2219_v13  ;;  %v3335_v13 = vld [vmem:[#allocation10_spill] sm:$0xff] }
 0x40a   :  { %3319 = vst [vmem:[#allocation23_spill] sm:$0xff] %v2881_v26  ;;  %v1663_v20 = vadd.f32 %v1662_v50, %v1657_v28 }
 0x40b   :  { %v200_v41 = vmul.f32 %v198_v33, %v2636_v19  ;;  %v214_v51 = vmul.f32 %v212_v39, %v2647_v53  ;;  %v230_v24 = vmul.f32 %v228_v45, %v2649_v17 }
 0x40c   :  { %v1669_v31 = vadd.f32 %v1668_v15, %v1663_v20  ;;  %v3329_v15 = vld [vmem:[#allocation7_spill] sm:$0xff] }
 0x40d   :  { %v216_v63 = vadd.f32 %v214_v51, %v200_v41  ;;  %v3339_v41 = vld [vmem:[#allocation17_spill] sm:$0xff] }
 0x40e   :  { %v1670_v48 = vadd.f32 %v1669_v31, %v2273_v32  ;;  %v28_v32 = vld [vmem:[%s3143_s1 + $0x38] sm:$0xff]  ;;  %v3330_v31 = vld [vmem:[#allocation8_spill] sm:$0xff] }
 0x40f   :  { %v232_v50 = vadd.f32 %v230_v24, %v216_v63  ;;  %v3341_v24 = vld [vmem:[#allocation3_spill] sm:$0xff] }
 0x410   :  { %1749 = vperm.xlu0 %2142, %v1670_v48   ;;  %1741 = vperm.xlu1 %2144, %v1670_v48  }
 0x411   :  { %v2925_v63 = vadd.f32 %v2657_v23, %v232_v50  ;;  %v199_v23 = vmul.f32 %v198_v33, %v2829_v61  ;;  %v3350_v33 = vld [vmem:[#allocation37_spill] sm:$0xff] }
 0x412   :  { %v1007_v26 = vmul.f32 %v3350_v33, %v2831_v29 }
 0x413   :  { %3340 = vst [vmem:[#allocation24_spill] sm:$0xff] %v2925_v63 }
 0x414   :  { %2147 = vset.pattern.permute.xlu0 %v3288_v7  ;;  %2145 = vset.pattern.permute.xlu1 %v3320_v37  ;;  %v3325_v7 = vmov 0  }
 0x415   :  { %1785 = vperm.xlu0 %2147, %v1670_v48   ;;  %1761 = vperm.xlu1 %2145, %v1670_v48  }
 0x419   :  { %2151 = vset.pattern.permute.xlu0 %v3321_v14  ;;  %2146 = vset.pattern.permute.xlu1 %v3322_v36 }
 0x41a   :  { %1821 = vperm.xlu0 %2151, %v1670_v48   ;;  %1773 = vperm.xlu1 %2146, %v1670_v48  }
 0x41e   :  { %2152 = vset.pattern.permute.xlu0 %v3320_v37  ;;  %2148 = vset.pattern.permute.xlu1 %v3323_v21  ;;  %v3334_v21 = vld [vmem:[#allocation13_spill] sm:$0xff] }
 0x41f   :  { %791 = vperm.xlu0 %2152, %v3324_v58   ;;  %1797 = vperm.xlu1 %2148, %v1670_v48  }
 0x423   :  { %2154 = vset.pattern.permute.xlu0 %v3325_v7  ;;  %2149 = vset.pattern.permute.xlu1 %v3326_v4  ;;  %v3336_v7 = vld [vmem:[#allocation14_spill] sm:$0xff]  ;;  %v3337_v4 = vld [vmem:[#allocation15_spill] sm:$0xff] }
 0x424   :  { %235 = vperm.xlu0 %2154, %v28_v32   ;;  %1809 = vperm.xlu1 %2149, %v1670_v48  }
 0x428   :  { %2150 = vset.pattern.permute.xlu1 %v3320_v37  ;;  %2155 = vset.pattern.permute.xlu0 %v3321_v14  ;;  %v3331_v37 = vld [vmem:[#allocation9_spill] sm:$0xff]  ;;  %v3332_v14 = vld [vmem:[#allocation11_spill] sm:$0xff] }
 0x429   :  { %787 = vperm.xlu1 %2150, %v3327_v18  }
 0x42d   :  { %2153 = vset.pattern.permute.xlu1 %v3322_v36  ;;  %v3333_v36 = vld [vmem:[#allocation12_spill] sm:$0xff] }
 0x42e   :  { %799 = vperm.xlu1 %2153, %v3327_v18  }
 0x432   :  { %803 = vperm.xlu1 %2153, %v3324_v58  }
 0x48b   :  { %v1742_v57 = vpop.permute.xlu1 %1741  ;;  %v1750_v28 = vpop.permute.xlu0 %1749 }
 0x48c   :  { %v1752_v20 = vmul.f32 %v1750_v28, %v3329_v15  ;;  %v1753_v48 = vmul.f32 %v1750_v28, %v3330_v31  ;;  %v1754_v9 = vmul.f32 %v1750_v28, %v3331_v37  ;;  %v1744_v10 = vmul.f32 %v1742_v57, %v3332_v14 }
 0x48d   :  { %v1745_v19 = vmul.f32 %v1742_v57, %v3333_v36  ;;  %v1746_v53 = vmul.f32 %v1742_v57, %v3334_v21  ;;  %v1755_v32 = vmul.f32 %v1750_v28, %v3335_v13  ;;  %v1747_v17 = vmul.f32 %v1742_v57, %v3336_v7  ;;  %v3342_v21 = vld [vmem:[#allocation18_spill] sm:$0xff]  ;;  %v3343_v57 = vld [vmem:[#allocation40_spill] sm:$0xff] }
 0x48e   :  { %v772_v15 = vmul.f32 %v2859_v5, %v3341_v24  ;;  %v1756_v37 = vadd.f32 %v1752_v20, %v1744_v10  ;;  %v1405_v13 = vmul.f32 %v3343_v57, %v2859_v5  ;;  %v3344_v7 = vld [vmem:[#allocation4_spill] sm:$0xff] }
 0x48f   :  { %v1757_v14 = vadd.f32 %v1753_v48, %v1745_v19  ;;  %v1758_v36 = vadd.f32 %v1754_v9, %v1746_v53  ;;  %v1759_v42 = vadd.f32 %v1755_v32, %v1747_v17  ;;  %v3346_v48 = vld [vmem:[#allocation19_spill] sm:$0xff]  ;;  %v3347_v10 = vld [vmem:[#allocation20_spill] sm:$0xff]  ;;  %v3348_v53 = vld [vmem:[#allocation21_spill] sm:$0xff]  ;;  %v773_v17 = vmul.f32 %v2833_v30, %v3341_v24 }
 0x490   :  { %v1762_v58 = vpop.permute.xlu1 %1761  ;;  %v1786_v31 = vpop.permute.xlu0 %1785  ;;  %v229_v24 = vmul.f32 %v228_v45, %v2844_v2 }
 0x491   :  { %v1764_v18 = vmul.f32 %v1762_v58, %v3337_v4  ;;  %v1765_v0 = vmul.f32 %v1762_v58, %v3338_v22  ;;  %v1766_v51 = vmul.f32 %v1762_v58, %v3339_v41  ;;  %v1767_v28 = vmul.f32 %v1762_v58, %v3342_v21  ;;  %v3345_v22 = vld [vmem:[#allocation41_spill] sm:$0xff]  ;;  %v3349_v21 = vld [vmem:[#allocation36_spill] sm:$0xff] }
 0x492   :  { %v783_v4 = vmul.f32 %v2868_v47, %v3344_v7  ;;  %v1408_v41 = vmul.f32 %v3345_v22, %v2868_v47  ;;  %v1001_v63 = vmul.f32 %v3349_v21, %v2829_v61  ;;  %v213_v47 = vmul.f32 %v212_v39, %v2831_v29  ;;  %v3355_v21 = vld [vmem:[#allocation5_spill] sm:$0xff] }
 0x493   :  { %v1768_v56 = vadd.f32 %v1764_v18, %v1756_v37  ;;  %v1769_v1 = vadd.f32 %v1765_v0, %v1757_v14  ;;  %v1770_v20 = vadd.f32 %v1766_v51, %v1758_v36  ;;  %v1771_v32 = vadd.f32 %v1767_v28, %v1759_v42 }
 0x494   :  { %v1406_v14 = vmul.f32 %v3343_v57, %v2833_v30  ;;  %v1789_v61 = vmul.f32 %v1786_v31, %v3310_v11  ;;  %v782_v29 = vmul.f32 %v2835_v52, %v3344_v7  ;;  %v1407_v42 = vmul.f32 %v3345_v22, %v2835_v52 }
 0x495   :  { %v1774_v50 = vpop.permute.xlu1 %1773  ;;  %v1822_v18 = vpop.permute.xlu0 %1821  ;;  %v215_v57 = vadd.f32 %v213_v47, %v199_v23  ;;  %v1009_v11 = vadd.f32 %v1007_v26, %v1001_v63 }
 0x496   :  { %v1776_v9 = vmul.f32 %v1774_v50, %v3346_v48  ;;  %v1777_v19 = vmul.f32 %v1774_v50, %v3347_v10  ;;  %v1778_v58 = vmul.f32 %v1774_v50, %v3348_v53  ;;  %v1779_v5 = vmul.f32 %v1774_v50, %v3308_v3 }
 0x497   :  { %v1788_v3 = vmul.f32 %v1786_v31, %v3309_v40  ;;  %v785_v48 = vadd.f32 %v783_v4, %v773_v17  ;;  %v2963_v45 = vadd.f32 %v1408_v41, %v1406_v14  ;;  %v1409_v22 = vadd.f32 %v1407_v42, %v1405_v13  ;;  %v3356_v17 = vld [vmem:[#allocation33_spill] sm:$0xff] }
 0x498   :  { %v1780_v0 = vadd.f32 %v1776_v9, %v1768_v56  ;;  %v1781_v51 = vadd.f32 %v1777_v19, %v1769_v1  ;;  %v1782_v37 = vadd.f32 %v1778_v58, %v1770_v20  ;;  %v1783_v36 = vadd.f32 %v1779_v5, %v1771_v32  ;;  %v3352_v19 = vld [vmem:[#allocation30_spill] sm:$0xff] }
 0x499   :  { %v1790_v1 = vmul.f32 %v1786_v31, %v3311_v38  ;;  %v1791_v56 = vmul.f32 %v1786_v31, %v3312_v59  ;;  %v784_v38 = vadd.f32 %v782_v29, %v772_v15  ;;  %v3351_v59 = vld [vmem:[#allocation38_spill] sm:$0xff]  ;;  %v1824_v26 = vmul.f32 %v1822_v18, %v2504_v43 }
 0x49a   :  { %v1798_v39 = vpop.permute.xlu1 %1797  ;;  %v1792_v28 = vadd.f32 %v1788_v3, %v1780_v0  ;;  %v1793_v30 = vadd.f32 %v1789_v61, %v1781_v51  ;;  %v1015_v31 = vmul.f32 %v3351_v59, %v2844_v2  ;;  %v792_v10 = vpop.permute.xlu0 %791  ;;  %v1825_v15 = vmul.f32 %v1822_v18, %v2507_v44  ;;  %v3357_v51 = vld [vmem:[#allocation42_spill] sm:$0xff]  ;;  %v3359_v59 = vld [vmem:[#allocation43_spill] sm:$0xff] }
 0x49b   :  { %v1800_v40 = vmul.f32 %v1798_v39, %v3313_v27  ;;  %v1794_v50 = vadd.f32 %v1790_v1, %v1782_v37  ;;  %v1801_v20 = vmul.f32 %v1798_v39, %v3314_v8  ;;  %v1795_v7 = vadd.f32 %v1791_v56, %v1783_v36 }
 0x49c   :  { %v1802_v9 = vmul.f32 %v1798_v39, %v3315_v16  ;;  %v1803_v52 = vmul.f32 %v1798_v39, %v2484_v25  ;;  %v231_v8 = vadd.f32 %v229_v24, %v215_v57  ;;  %v3353_v16 = vld [vmem:[#allocation31_spill] sm:$0xff]  ;;  %v3354_v25 = vld [vmem:[#allocation32_spill] sm:$0xff]  ;;  %v1826_v13 = vmul.f32 %v1822_v18, %v2510_v62 }
 0x49d   :  { %v1804_v63 = vadd.f32 %v1800_v40, %v1792_v28  ;;  %v1805_v23 = vadd.f32 %v1801_v20, %v1793_v30  ;;  %v795_v47 = vmul.f32 %v792_v10, %v3355_v21  ;;  %v1827_v0 = vmul.f32 %v1822_v18, %v3356_v17 }
 0x49e   :  { %v1806_v4 = vadd.f32 %v1802_v9, %v1794_v50  ;;  %v1807_v5 = vadd.f32 %v1803_v52, %v1795_v7  ;;  %v1412_v37 = vmul.f32 %v3357_v51, %v792_v10  ;;  %v1017_v14 = vadd.f32 %v1015_v31, %v1009_v11 }
 0x49f   :  { %v1810_v27 = vpop.permute.xlu1 %1809  ;;  %v236_v36 = vpop.permute.xlu0 %235  ;;  %v797_v56 = vadd.f32 %v795_v47, %v785_v48 }
 0x4a0   :  { %v1812_v53 = vmul.f32 %v1810_v27, %v3352_v19  ;;  %v1813_v58 = vmul.f32 %v1810_v27, %v3353_v16  ;;  %v1814_v41 = vmul.f32 %v1810_v27, %v3354_v25  ;;  %v1815_v2 = vmul.f32 %v1810_v27, %v2501_v60 }
 0x4a1   :  { %v2015_v60 = vmul.f32 %v2866_v35, %v792_v10  ;;  %v243_v40 = vadd.f32 %v236_v36, %v231_v8  ;;  %v1626_v27 = vadd.f32 %v2848_v55, %v236_v36 }
 0x4a2   :  { %v1816_v43 = vadd.f32 %v1812_v53, %v1804_v63  ;;  %v1817_v33 = vadd.f32 %v1813_v58, %v1805_v23  ;;  %v1818_v32 = vadd.f32 %v1814_v41, %v1806_v4  ;;  %v1819_v3 = vadd.f32 %v1815_v2, %v1807_v5 }
 0x4a4   :  { %v788_v61 = vpop.permute.xlu1 %787  ;;  %v1828_v39 = vadd.f32 %v1824_v26, %v1816_v43  ;;  %v1829_v44 = vadd.f32 %v1825_v15, %v1817_v33  ;;  %v1830_v29 = vadd.f32 %v1826_v13, %v1818_v32  ;;  %v1831_v42 = vadd.f32 %v1827_v0, %v1819_v3  ;;  %v3360_v32 = vld [vmem:[#allocation23_spill] sm:$0xff] }
 0x4a5   :  { %v794_v62 = vmul.f32 %v788_v61, %v3355_v21  ;;  %v1411_v24 = vmul.f32 %v3357_v51, %v788_v61  ;;  %v2014_v1 = vmul.f32 %v2866_v35, %v788_v61  ;;  %v1019_v15 = vadd.f32 %v1017_v14, %v236_v36  ;;  %v3361_v14 = vld [vmem:[#allocation24_spill] sm:$0xff] }
 0x4a6   :  { %v2982_v18 = vadd.f32 %v1828_v39, %v2821_v54  ;;  %v2985_v28 = vadd.f32 %v1829_v44, %v2823_v49  ;;  %v2988_v30 = vadd.f32 %v1830_v29, %v2825_v6  ;;  %v2991_v57 = vadd.f32 %v1831_v42, %v2827_v46 }
 0x4a7   :  { %v796_v11 = vadd.f32 %v794_v62, %v784_v38  ;;  %v1413_v50 = vadd.f32 %v1411_v24, %v1409_v22  ;;  %v2016_v20 = vadd.f32 %v2014_v1, %v2883_v12  ;;  %v3358_v38 = vld [vmem:[#allocation6_spill] sm:$0xff]  ;;  %v1414_v33 = vadd.f32 %v1412_v37, %v2963_v45 }
 0x4a8   :  { %v1836_v35 = vsel %vm584_vm0, %v2982_v18, -inf  ;;  %v1843_v54 = vsel %vm584_vm0, %v2985_v28, -inf  ;;  %v1850_v49 = vsel %vm584_vm0, %v2988_v30, -inf  ;;  %v1857_v9 = vsel %vm584_vm0, %v2991_v57, -inf }
 0x4a9   :  { %v800_v6 = vpop.permute.xlu1 %799  ;;  %v1837_v48 = vrot.slane %v1836_v35, 4  ;;  %v1844_v7 = vrot.slane %v1843_v54, 4  ;;  %v1851_v46 = vrot.slane %v1850_v49, 4  ;;  %v1858_v52 = vrot.slane %v1857_v9, 4 }
 0x4aa   :  { %v806_v22 = vmul.f32 %v800_v6, %v3358_v38  ;;  %v1415_v31 = vmul.f32 %v3359_v59, %v800_v6  ;;  %v2018_v10 = vmul.f32 %v2873_v34, %v800_v6  ;;  %v2017_v17 = vadd.f32 %v2015_v60, %v3360_v32 }
 0x4ab   :  { %v1838_v26 = vmax.f32 %v1836_v35, %v1837_v48  ;;  %v1845_v63 = vmax.f32 %v1843_v54, %v1844_v7  ;;  %v1852_v12 = vmax.f32 %v1850_v49, %v1851_v46  ;;  %v1859_v23 = vmax.f32 %v1857_v9, %v1858_v52  ;;  %v3363_v52 = vld [vmem:[#allocation39_spill] sm:$0xff] }
 0x4ac   :  { %v808_v8 = vadd.f32 %v806_v22, %v796_v11  ;;  %v1417_v4 = vadd.f32 %v1415_v31, %v1413_v50  ;;  %v2020_v19 = vadd.f32 %v2018_v10, %v2016_v20  ;;  %v3364_v22 = vld [vmem:[#allocation22_spill] sm:$0xff] }
 0x4ad   :  { %v804_v53 = vpop.permute.xlu1 %803  ;;  %v1839_v16 = vrot.slane %v1838_v26, 2  ;;  %v1846_v58 = vrot.slane %v1845_v63, 2  ;;  %v1853_v25 = vrot.slane %v1852_v12, 2  ;;  %v1860_v13 = vrot.slane %v1859_v23, 2 }
 0x4ae   :  { %v807_v41 = vmul.f32 %v804_v53, %v3358_v38  ;;  %v3007_v5 = vadd.f32 %v808_v8, %v243_v40  ;;  %v3009_v2 = vadd.f32 %v2020_v19, %v1626_v27  ;;  %v3013_v51 = vadd.f32 %v1417_v4, %v1019_v15 }
 0x4af   :  { %v1840_v55 = vmax.f32 %v1838_v26, %v1839_v16  ;;  %v1847_v21 = vmax.f32 %v1845_v63, %v1846_v58  ;;  %v1854_v47 = vmax.f32 %v1852_v12, %v1853_v25  ;;  %v1861_v0 = vmax.f32 %v1859_v23, %v1860_v13 }
 0x4b0   :  { %v809_v43 = vadd.f32 %v807_v41, %v797_v56  ;;  %v813_v29 = vsel %vm812_vm11, %v3007_v5, -inf  ;;  %v1416_v62 = vmul.f32 %v3359_v59, %v804_v53  ;;  %v2019_v42 = vmul.f32 %v2873_v34, %v804_v53  ;;  %v3362_v34 = vld [vmem:[#allocation34_spill] sm:$0xff] }
 0x4b1   :  { %v1841_v3 = vrot.slane %v1840_v55, 1  ;;  %v1848_v61 = vrot.slane %v1847_v21, 1  ;;  %v1855_v39 = vrot.slane %v1854_v47, 1  ;;  %v1862_v44 = vrot.slane %v1861_v0, 1 }
 0x4b2   :  { %v3016_v36 = vadd.f32 %v809_v43, %v3361_v14  ;;  %v1421_v56 = vsel %vm812_vm11, %v3013_v51, -inf  ;;  %v1418_v11 = vadd.f32 %v1416_v62, %v1414_v33  ;;  %v2021_v50 = vadd.f32 %v2019_v42, %v2017_v17  ;;  %v3365_v43 = vld [vmem:[#allocation2_spill] sm:$0xff] }
 0x4b3   :  { %v1842_v45 = vmax.f32 %v1840_v55, %v1841_v3  ;;  %v1849_v37 = vmax.f32 %v1847_v21, %v1848_v61  ;;  %v1856_v60 = vmax.f32 %v1854_v47, %v1855_v39  ;;  %v1863_v1 = vmax.f32 %v1861_v0, %v1862_v44 }
 0x4b4   :  { %v815_v24 = vsel %vm814_vm12, %v3016_v36, -inf  ;;  %v3039_v38 = vadd.f32 %v1418_v11, %v3363_v52  ;;  %v3042_v59 = vadd.f32 %v2021_v50, %v3364_v22  ;;  %v2024_v26 = vsel %vm812_vm11, %v3009_v2, -inf }
 0x4b5   :  { %v816_v40 = vmax.f32 %v813_v29, %v815_v24  ;;  %vm1864_vm13 = vcmp.ge.f32.partialorder %v2982_v18, %v1842_v45  ;;  %vm1865_vm14 = vcmp.ge.f32.partialorder %v2985_v28, %v1849_v37  ;;  %vm1866_vm15 = vcmp.ge.f32.partialorder %v2988_v30, %v1856_v60 }
 0x4b6   :  { %vm1867_vm1 = vcmp.ge.f32.partialorder %v2991_v57, %v1863_v1  ;;  %v1868_v35 = vsel %vm1864_vm13, %v3362_v34, 7.0  ;;  %v1869_v54 = vsel %vm1865_vm14, %v3362_v34, 7.0  ;;  %v1870_v49 = vsel %vm1866_vm15, %v3362_v34, 7.0 }
 0x4b7   :  { %v1871_v20 = vsel %vm1867_vm1, %v3362_v34, 7.0  ;;  %v1872_v6 = vsel %vm584_vm0, %v1868_v35, inf  ;;  %v1879_v48 = vsel %vm584_vm0, %v1869_v54, inf  ;;  %v1886_v18 = vsel %vm584_vm0, %v1870_v49, inf }
 0x4b8   :  { %v1873_v28 = vrot.slane %v1872_v6, 4  ;;  %v1880_v7 = vrot.slane %v1879_v48, 4  ;;  %v1887_v30 = vrot.slane %v1886_v18, 4  ;;  %v1893_v46 = vsel %vm584_vm0, %v1871_v20, inf }
 0x4b9   :  { %v1894_v57 = vrot.slane %v1893_v46, 4  ;;  %v817_v9 = vrot.slane %v816_v40, 4  ;;  %v1422_v23 = vsel %vm814_vm12, %v3039_v38, -inf  ;;  %v2025_v8 = vsel %vm814_vm12, %v3042_v59, -inf }
 0x4ba   :  { %v1874_v31 = vmin.f32 %v1872_v6, %v1873_v28  ;;  %v1881_v10 = vmin.f32 %v1879_v48, %v1880_v7  ;;  %v1888_v27 = vmin.f32 %v1886_v18, %v1887_v30  ;;  %v1423_v16 = vmax.f32 %v1421_v56, %v1422_v23 }
 0x4bb   :  { %v1895_v63 = vmin.f32 %v1893_v46, %v1894_v57  ;;  %v818_v12 = vmax.f32 %v816_v40, %v817_v9  ;;  %v2026_v41 = vmax.f32 %v2024_v26, %v2025_v8  ;;  %v823_v33 = vadd.s32 8, %v3365_v43 }
 0x4bc   :  { %v1875_v4 = vrot.slane %v1874_v31, 2  ;;  %v1882_v19 = vrot.slane %v1881_v10, 2  ;;  %v1889_v53 = vrot.slane %v1888_v27, 2  ;;  %v1424_v21 = vrot.slane %v1423_v16, 4 }
 0x4bd   :  { %v1896_v58 = vrot.slane %v1895_v63, 2  ;;  %v819_v25 = vrot.slane %v818_v12, 2  ;;  %v2027_v17 = vrot.slane %v2026_v41, 4  ;;  %v3053_v24 = vcvt.s32.f32 %v823_v33 }
 0x4be   :  { %v1876_v15 = vmin.f32 %v1874_v31, %v1875_v4  ;;  %v1883_v13 = vmin.f32 %v1881_v10, %v1882_v19  ;;  %v1890_v55 = vmin.f32 %v1888_v27, %v1889_v53  ;;  %v1425_v39 = vmax.f32 %v1423_v16, %v1424_v21 }
 0x4bf   :  { %v1897_v47 = vmin.f32 %v1895_v63, %v1896_v58  ;;  %v820_v32 = vmax.f32 %v818_v12, %v819_v25  ;;  %v3051_v29 = vmax.f32 %v2026_v41, %v2027_v17  ;;  %v3366_v11 = vmov 0.0  }
 0x4c0   :  { %v1877_v0 = vrot.slane %v1876_v15, 1  ;;  %v1884_v3 = vrot.slane %v1883_v13, 1  ;;  %v1891_v61 = vrot.slane %v1890_v55, 1  ;;  %v1426_v37 = vrot.slane %v1425_v39, 2 }
 0x4c1   :  { %v1898_v14 = vrot.slane %v1897_v47, 1  ;;  %v821_v44 = vrot.slane %v820_v32, 1  ;;  %v2029_v56 = vrot.slane %v3051_v29, 2 }
 0x4c2   :  { %v1878_v62 = vmin.f32 %v1876_v15, %v1877_v0  ;;  %v1885_v42 = vmin.f32 %v1883_v13, %v1884_v3  ;;  %v1892_v45 = vmin.f32 %v1890_v55, %v1891_v61  ;;  %v3061_v40 = vmax.f32 %v1425_v39, %v1426_v37 }
 0x4c3   :  { %v1899_v60 = vmin.f32 %v1897_v47, %v1898_v14  ;;  %v3055_v1 = vmax.f32 %v820_v32, %v821_v44 }
 0x4c4   :  { %vm1900_vm0 = vcmp.eq.f32.partialorder %v3362_v34, %v1878_v62  ;;  %vm1901_vm2 = vcmp.eq.f32.partialorder %v3362_v34, %v1885_v42  ;;  %vm1902_vm3 = vcmp.eq.f32.partialorder %v3362_v34, %v1892_v45 }
 0x4c5   :  { %vm1903_vm4 = vcmp.eq.f32.partialorder %v3362_v34, %v1899_v60  ;;  %v2092_v50 = vsel %vm1900_vm0, 1.0, %v3366_v11  ;;  %v2093_v35 = vsel %vm1901_vm2, 1.0, %v3366_v11  ;;  %v2094_v54 = vsel %vm1902_vm3, 1.0, %v3366_v11 }
 0x4c6   :  { %v2095_v49 = vsel %vm1903_vm4, 1.0, %v3366_v11  ;;  %v1916_v20 = vrot.slane %v2092_v50, 1  ;;  %v1917_v6 = vrot.slane %v2093_v35, 1  ;;  %v1918_v48 = vrot.slane %v2094_v54, 1 }
 0x4c7   :  { %v1919_v18 = vrot.slane %v2095_v49, 1  ;;  %v1928_v28 = vrot.slane %v2092_v50, 3  ;;  %v1929_v7 = vrot.slane %v2093_v35, 3  ;;  %v1930_v30 = vrot.slane %v2094_v54, 3 }
 0x4c8   :  { %v1924_v46 = vmax.f32 %v2092_v50, %v1916_v20  ;;  %v1925_v57 = vmax.f32 %v2093_v35, %v1917_v6  ;;  %v1926_v9 = vmax.f32 %v2094_v54, %v1918_v48  ;;  %v1931_v52 = vrot.slane %v2095_v49, 3 }
 0x4c9   :  { %v1927_v22 = vmax.f32 %v2095_v49, %v1919_v18  ;;  %v1940_v31 = vrot.slane %v2092_v50, 4  ;;  %v1941_v10 = vrot.slane %v2093_v35, 4  ;;  %v1942_v27 = vrot.slane %v2094_v54, 4 }
 0x4ca   :  { %v1936_v26 = vmax.f32 %v1924_v46, %v1928_v28  ;;  %v1937_v63 = vmax.f32 %v1925_v57, %v1929_v7  ;;  %v1938_v12 = vmax.f32 %v1926_v9, %v1930_v30  ;;  %v1943_v23 = vrot.slane %v2095_v49, 4 }
 0x4cb   :  { %v1939_v8 = vmax.f32 %v1927_v22, %v1931_v52  ;;  %v1952_v4 = vrot.slane %v2092_v50, 2  ;;  %v1953_v19 = vrot.slane %v2093_v35, 2  ;;  %v1954_v53 = vrot.slane %v2094_v54, 2 }
 0x4cc   :  { %v1948_v16 = vmax.f32 %v1936_v26, %v1940_v31  ;;  %v1949_v58 = vmax.f32 %v1937_v63, %v1941_v10  ;;  %v1950_v25 = vmax.f32 %v1938_v12, %v1942_v27  ;;  %v1955_v41 = vrot.slane %v2095_v49, 2 }
 0x4cd   :  { %v1951_v15 = vmax.f32 %v1939_v8, %v1943_v23  ;;  %v1960_v13 = vmax.f32 %v1924_v46, %v1952_v4  ;;  %v1961_v55 = vmax.f32 %v1925_v57, %v1953_v19  ;;  %v1962_v21 = vmax.f32 %v1926_v9, %v1954_v53 }
 0x4ce   :  { %v1963_v47 = vmax.f32 %v1927_v22, %v1955_v41  ;;  %v1968_v43 = vrot.slane %v1936_v26, 3  ;;  %v1969_v33 = vrot.slane %v1937_v63, 3  ;;  %v1970_v32 = vrot.slane %v1938_v12, 3 }
 0x4cf   :  { %v1971_v17 = vrot.slane %v1939_v8, 3  ;;  %v1980_v0 = vrot.slane %v1948_v16, 7  ;;  %v1981_v3 = vrot.slane %v1949_v58, 7  ;;  %v1982_v61 = vrot.slane %v1950_v25, 7 }
 0x4d0   :  { %v1983_v39 = vrot.slane %v1951_v15, 7  ;;  %v1992_v14 = vrot.slane %v1960_v13, 7  ;;  %v1993_v44 = vrot.slane %v1961_v55, 7  ;;  %v1994_v62 = vrot.slane %v1962_v21, 7 }
 0x4d1   :  { %v1995_v42 = vrot.slane %v1963_v47, 7  ;;  %v2000_v45 = vsel %vm752_vm9, %v1968_v43, %v1980_v0  ;;  %v2001_v37 = vsel %vm752_vm9, %v1969_v33, %v1981_v3  ;;  %v2002_v60 = vsel %vm752_vm9, %v1970_v32, %v1982_v61 }
 0x4d2   :  { %v2003_v50 = vsel %vm752_vm9, %v1971_v17, %v1983_v39  ;;  %v2004_v35 = vsel %vm757_vm10, %v2000_v45, %v1992_v14  ;;  %v2005_v54 = vsel %vm757_vm10, %v2001_v37, %v1993_v44  ;;  %v2006_v49 = vsel %vm757_vm10, %v2002_v60, %v1994_v62 }
 0x4d3   :  { %v2007_v20 = vsel %vm757_vm10, %v2003_v50, %v1995_v42  ;;  %v2056_v6 = vcombine.low %v2004_v35, %v2005_v54  ;;  %vm825_vm5 = vcmp.ge.f32.partialorder %v3007_v5, %v3055_v1  ;;  %vm826_vm6 = vcmp.ge.f32.partialorder %v3016_v36, %v3055_v1 }
 0x4d4   :  { %v2057_v48 = vcombine.low %v2006_v49, %v2007_v20  ;;  %v827_v18 = vsel %vm825_vm5, %v3362_v34, 10.0  ;;  %v828_v28 = vsel %vm826_vm6, %v3053_v24, 10.0  ;;  %v1428_v7 = vrot.slane %v3061_v40, 1 }
 0x4d5   :  { %2098 = vst [vmem:[%s3145_s2 + $0x20] sm:$0x77] %v2056_v6  ;;  %v829_v30 = vsel %vm812_vm11, %v827_v18, inf  ;;  %v830_v46 = vsel %vm814_vm12, %v828_v28, inf  ;;  %v2030_v5 = vmax.f32 %v3051_v29, %v2029_v56 }
 0x4d6   :  { %2099 = vst [vmem:[%s3145_s2 + $0x28] sm:$0x77] %v2057_v48  ;;  %v831_v36 = vmin.f32 %v829_v30, %v830_v46  ;;  %v1429_v1 = vmax.f32 %v3061_v40, %v1428_v7 }
 0x4d7   :  { %v2031_v57 = vrot.slane %v2030_v5, 1 }
 0x4d8   :  { %v832_v9 = vrot.slane %v831_v36, 4  ;;  %vm1430_vm9 = vcmp.ge.f32.partialorder %v3013_v51, %v1429_v1  ;;  %vm1431_vm10 = vcmp.ge.f32.partialorder %v3039_v38, %v1429_v1 }
 0x4d9   :  { %v1432_v52 = vsel %vm1430_vm9, %v3362_v34, 10.0  ;;  %v1433_v22 = vsel %vm1431_vm10, %v3053_v24, 10.0  ;;  %v2032_v31 = vmax.f32 %v2030_v5, %v2031_v57 }
 0x4da   :  { %v833_v10 = vmin.f32 %v831_v36, %v832_v9  ;;  %v1434_v29 = vsel %vm812_vm11, %v1432_v52, inf  ;;  %v1435_v56 = vsel %vm814_vm12, %v1433_v22, inf }
 0x4db   :  { %v1436_v27 = vmin.f32 %v1434_v29, %v1435_v56  ;;  %vm2033_vm7 = vcmp.ge.f32.partialorder %v3009_v2, %v2032_v31  ;;  %vm2034_vm8 = vcmp.ge.f32.partialorder %v3042_v59, %v2032_v31 }
 0x4dc   :  { %v834_v40 = vrot.slane %v833_v10, 2  ;;  %v2035_v51 = vsel %vm2033_vm7, %v3362_v34, 10.0  ;;  %v2036_v38 = vsel %vm2034_vm8, %v3053_v24, 10.0 }
 0x4dd   :  { %v1437_v26 = vrot.slane %v1436_v27, 4  ;;  %v2037_v63 = vsel %vm812_vm11, %v2035_v51, inf  ;;  %v2038_v12 = vsel %vm814_vm12, %v2036_v38, inf }
 0x4de   :  { %v835_v23 = vmin.f32 %v833_v10, %v834_v40  ;;  %v2039_v8 = vmin.f32 %v2037_v63, %v2038_v12 }
 0x4df   :  { %v1438_v4 = vmin.f32 %v1436_v27, %v1437_v26 }
 0x4e0   :  { %v836_v19 = vrot.slane %v835_v23, 1  ;;  %v2040_v53 = vrot.slane %v2039_v8, 4 }
 0x4e1   :  { %v1439_v16 = vrot.slane %v1438_v4, 2 }
 0x4e2   :  { %v837_v58 = vmin.f32 %v835_v23, %v836_v19  ;;  %v2041_v2 = vmin.f32 %v2039_v8, %v2040_v53 }
 0x4e3   :  { %v1440_v25 = vmin.f32 %v1438_v4, %v1439_v16 }
 0x4e4   :  { %vm838_vm13 = vcmp.eq.f32.partialorder %v3362_v34, %v837_v58  ;;  %vm839_vm14 = vcmp.eq.f32.partialorder %v3053_v24, %v837_v58  ;;  %v2042_v59 = vrot.slane %v2041_v2, 2 }
 0x4e5   :  { %v2078_v41 = vsel %vm838_vm13, 1.0, %v3366_v11  ;;  %v2079_v15 = vsel %vm839_vm14, 1.0, %v3366_v11  ;;  %v1441_v13 = vrot.slane %v1440_v25, 1 }
 0x4e6   :  { %854 = vst.msk [vmem:[%s3146_s3] sm:$0xff] %vm812_vm11, %v2078_v41  ;;  %v2043_v55 = vmin.f32 %v2041_v2, %v2042_v59 }
 0x4e7   :  { %855 = vst.msk [vmem:[%s3146_s3 + $0x8] sm:$0x3] %vm814_vm12, %v2079_v15  ;;  %v1442_v21 = vmin.f32 %v1440_v25, %v1441_v13 }
 0x4e8   :  { %v2044_v47 = vrot.slane %v2043_v55, 1 }
 0x4e9   :  { %vm1443_vm15 = vcmp.eq.f32.partialorder %v3362_v34, %v1442_v21  ;;  %vm1444_vm1 = vcmp.eq.f32.partialorder %v3053_v24, %v1442_v21 }
 0x4ea   :  { %v2085_v43 = vsel %vm1443_vm15, 1.0, %v3366_v11  ;;  %v2086_v33 = vsel %vm1444_vm1, 1.0, %v3366_v11  ;;  %v2045_v32 = vmin.f32 %v2043_v55, %v2044_v47 }
 0x4eb   :  { %2089 = vst.msk [vmem:[%s3146_s3 + $0x10] sm:$0xff] %vm812_vm11, %v2085_v43 }
 0x4ec   :  { %2090 = vst.msk [vmem:[%s3146_s3 + $0x18] sm:$0x3] %vm814_vm12, %v2086_v33  ;;  %vm2046_vm0 = vcmp.eq.f32.partialorder %v3362_v34, %v2045_v32  ;;  %vm2047_vm2 = vcmp.eq.f32.partialorder %v3053_v24, %v2045_v32 }
 0x4ed   :  { %v2096_v17 = vsel %vm2046_vm0, 1.0, %v3366_v11  ;;  %v2097_v0 = vsel %vm2047_vm2, 1.0, %v3366_v11 }
 0x4ee   :  { %2100 = vst.msk [vmem:[%s3146_s3 + $0x20] sm:$0xff] %vm812_vm11, %v2096_v17 }
 0x4ef   :  { %2101 = vst.msk [vmem:[%s3146_s3 + $0x28] sm:$0x3] %vm814_vm12, %v2097_v0 }

</bundles_post_ra>
